<compile_context>
chip_gen: v7x
topology: tpu7x:2x2x1
jax: 0.10.0
libtpu: 0.0.40
codegen_flags: <defaults>
</compile_context>

<pallas_src>
import math
import functools

import jax
import jax.numpy as jnp
from jax import lax
from jax.experimental import pallas as pl
from jax.experimental.pallas import tpu as pltpu


# ----------------------------------------------------------------------------
# Config (small toy shapes; see TODO above for production-size tiling)
# ----------------------------------------------------------------------------

CFG = dict(
    vocab_size=100, type_vocab_size=2, max_position=64,
    hidden=32, heads=4, head_dim=8, intermediate=64, layers=2,
    num_labels=4, batch=2, seq=8,
)

LANE = 128   # lane-dense padding for the classifier output


# ----------------------------------------------------------------------------
# Kernel helpers
# ----------------------------------------------------------------------------

def _layernorm(x, g, b, eps=1e-12):
    mean = jnp.mean(x, axis=-1, keepdims=True)
    var = jnp.mean((x - mean) ** 2, axis=-1, keepdims=True)
    return (x - mean) * lax.rsqrt(var + eps) * g + b


def _gelu(x):  # BERT gelu: x * 0.5 * (1 + erf(x / sqrt(2)))
    return x * 0.5 * (1.0 + lax.erf(x * jnp.float32(1.0 / math.sqrt(2.0))))


# ----------------------------------------------------------------------------
# Fused kernel: one (batch, layer) grid step processes one full encoder layer
# for one batch element.  Activations live in a VMEM scratch across layers.
# ----------------------------------------------------------------------------

def _bert_forward_kernel(S, H, Hh, dh, C, with_labels,
                         emb_ref, mask_ref, eg_ref, eb_ref,
                         wqkv_ref, bqkv_ref, wao_ref, bao_ref,
                         ag_ref, ab_ref, wi_ref, bi_ref, wo_ref, bo_ref,
                         og_ref, ob_ref, cw_ref, cb_ref, *refs):
    if with_labels:
        labels_ref, out_ref, x_scr, ctx_scr = refs
    else:
        out_ref, x_scr, ctx_scr = refs

    l = pl.program_id(1)
    n_layers = pl.num_programs(1)
    bf16 = jnp.bfloat16

    # ---- layer 0 only: embedding LayerNorm (hidden dropout == identity) ----
    @pl.when(l == 0)
    def _():
        x_scr[...] = _layernorm(emb_ref[...].astype(jnp.float32),
                                eg_ref[...], eb_ref[...])

    x = x_scr[...]                                    # (S, H) f32, VMEM resident
    xb = x.astype(bf16)

    # ---- Q/K/V: three full (S,H)@(H,H) bf16 matmuls, f32 accumulate --------
    q = jnp.dot(xb, wqkv_ref[0], preferred_element_type=jnp.float32) + bqkv_ref[0]
    k = jnp.dot(xb, wqkv_ref[1], preferred_element_type=jnp.float32) + bqkv_ref[1]
    v = jnp.dot(xb, wqkv_ref[2], preferred_element_type=jnp.float32) + bqkv_ref[2]

    mb = mask_ref[...]                                # (1, S) additive mask
    scale = jnp.float32(1.0 / math.sqrt(dh))

    # ---- multi-head self-attention -----------------------------------------
    # Per-head contexts go into the ctx VMEM scratch (no concatenate); the
    # attention-output projection is then ONE K=H matmul below.
    # TODO(synk): at dh=64 / S>=128 replace this unrolled head loop by a
    #             (Hh, S, dh) batched einsum or a heads grid axis so the MXU
    #             operands are lane-dense instead of dh-wide slices.
    for h in range(Hh):
        qh = q[:, h * dh:(h + 1) * dh].astype(bf16)
        kh = k[:, h * dh:(h + 1) * dh].astype(bf16)
        vh = v[:, h * dh:(h + 1) * dh].astype(bf16)
        # q @ k^T without materializing a transpose (contract dh of both).
        s = lax.dot_general(qh, kh, (((1,), (1,)), ((), ())),
                            preferred_element_type=jnp.float32)
        s = s * scale + mb
        s = s - jnp.max(s, axis=-1, keepdims=True)
        p = jnp.exp(s)
        p = p * pl.reciprocal(jnp.sum(p, axis=-1, keepdims=True), approx=True)
        ctx_scr[:, h * dh:(h + 1) * dh] = jnp.dot(
            p.astype(bf16), vh, preferred_element_type=jnp.float32)

    # single (S,H)@(H,H) attention-output projection (K = H, not K = dh)
    attn = (jnp.dot(ctx_scr[...].astype(bf16), wao_ref[...],
                    preferred_element_type=jnp.float32) + bao_ref[...])

    # residual + LayerNorm (attention-output dropout == identity)
    x1 = _layernorm(attn + x, ag_ref[...], ab_ref[...])

    # ---- feed-forward -------------------------------------------------------
    inter = _gelu(jnp.dot(x1.astype(bf16), wi_ref[...],
                          preferred_element_type=jnp.float32) + bi_ref[...])
    ffn = (jnp.dot(inter.astype(bf16), wo_ref[...],
                   preferred_element_type=jnp.float32) + bo_ref[...])
    x2 = _layernorm(ffn + x1, og_ref[...], ob_ref[...])

    x_scr[...] = x2                                   # carry to next layer

    # ---- last layer only: classifier (+ optional fused cross-entropy) ------
    @pl.when(l == n_layers - 1)
    def _():
        # lane-dense (S, 128) logits; padded columns have zero weight & bias.
        logits = (jnp.dot(x2.astype(bf16), cw_ref[...],
                          preferred_element_type=jnp.float32) + cb_ref[...])
        if with_labels:
            lbl = labels_ref[...]                     # (S, 1) int32
            col = lax.broadcasted_iota(jnp.int32, logits.shape, 1)
            ml = jnp.where(col < C, logits, jnp.float32(-1e30))   # mask pad cols
            m = jnp.max(ml, axis=-1, keepdims=True)
            lse = jnp.log(jnp.sum(jnp.exp(ml - m), axis=-1, keepdims=True)) + m
            picked = jnp.sum(jnp.where(col == lbl, logits, 0.0),
                             axis=-1, keepdims=True)
            out_ref[0, 0] = jnp.sum(lse - picked)     # per-batch CE partial sum
        else:
            out_ref[...] = logits.astype(out_ref.dtype)


# ----------------------------------------------------------------------------
# Parameters: per-layer weights stacked along L, big matrices stored in bf16
# ----------------------------------------------------------------------------

def init_params(key, cfg):
    H, I, L, C = cfg["hidden"], cfg["intermediate"], cfg["layers"], cfg["num_labels"]

    def nrm(k, shape, dtype):
        return (0.02 * jax.random.normal(k, shape)).astype(dtype)

    ks = jax.random.split(key, 8)
    cls_w = jnp.zeros((H, LANE), jnp.float32)
    cls_w = cls_w.at[:, :C].set(0.02 * jax.random.normal(ks[7], (H, C)))

    return {
        "word_emb": nrm(ks[0], (cfg["vocab_size"], H), jnp.float32),
        "pos_emb": nrm(ks[1], (cfg["max_position"], H), jnp.float32),
        "type_emb": nrm(ks[2], (cfg["type_vocab_size"], H), jnp.float32),
        "emb_ln_g": jnp.ones((1, H), jnp.float32),
        "emb_ln_b": jnp.zeros((1, H), jnp.float32),
        # stacked per-layer weights -> whole encoder stack in one pallas_call
        "w_qkv": nrm(ks[3], (L, 3, H, H), jnp.bfloat16),
        "b_qkv": jnp.zeros((L, 3, 1, H), jnp.float32),
        "w_ao": nrm(ks[4], (L, H, H), jnp.bfloat16),
        "b_ao": jnp.zeros((L, 1, H), jnp.float32),
        "aln_g": jnp.ones((L, 1, H), jnp.float32),
        "aln_b": jnp.zeros((L, 1, H), jnp.float32),
        "w_i": nrm(ks[5], (L, H, I), jnp.bfloat16),
        "b_i": jnp.zeros((L, 1, I), jnp.float32),
        "w_o": nrm(ks[6], (L, I, H), jnp.bfloat16),
        "b_o": jnp.zeros((L, 1, H), jnp.float32),
        "oln_g": jnp.ones((L, 1, H), jnp.float32),
        "oln_b": jnp.zeros((L, 1, H), jnp.float32),
        # lane-dense (128-wide) zero-padded classifier
        "cls_w": cls_w.astype(jnp.bfloat16),
        "cls_b": jnp.zeros((1, LANE), jnp.float32),
    }


# ----------------------------------------------------------------------------
# Forward wrapper (embedding gathers + mask arithmetic stay plain-JAX glue)
# ----------------------------------------------------------------------------

def bert_tagger_forward(params, input_ids, token_type_ids, attention_mask,
                        labels=None, cfg=CFG):
    B, S, H = cfg["batch"], cfg["seq"], cfg["hidden"]
    Hh, dh = cfg["heads"], cfg["head_dim"]
    L, C = cfg["layers"], cfg["num_labels"]
    I = cfg["intermediate"]
    M = B * S

    # --- embeddings (gathers stay in plain JAX) ---
    pos_ids = jnp.arange(S, dtype=jnp.int32)[None, :]
    emb = (jnp.take(params["word_emb"], input_ids, axis=0)
           + jnp.take(params["pos_emb"], pos_ids, axis=0)
           + jnp.take(params["type_emb"], token_type_ids, axis=0))      # (B,S,H)

    # HF-convention additive extended attention mask, per batch: (B, 1, S)
    ext_mask = ((1.0 - attention_mask.astype(jnp.float32)) * -10000.0
                ).reshape(B, 1, S)

    with_labels = labels is not None

    def const_spec(shape):               # resident across the whole grid
        zeros = (0,) * len(shape)
        return pl.BlockSpec(shape, lambda b, l: zeros)

    def batch_spec(shape):               # one slice per batch grid index
        zeros = (0,) * len(shape)
        return pl.BlockSpec((None,) + tuple(shape), lambda b, l: (b,) + zeros)

    def layer_spec(shape):               # one slice per layer grid index;
        zeros = (0,) * len(shape)        # index changes per l -> Pallas
        return pl.BlockSpec((None,) + tuple(shape),          # double-buffers /
                            lambda b, l: (l,) + zeros)        # prefetches l+1

    in_specs = [
        batch_spec((S, H)),              # summed embeddings
        batch_spec((1, S)),              # additive attention mask
        const_spec((1, H)),              # emb LN gamma
        const_spec((1, H)),              # emb LN beta
        layer_spec((3, H, H)),           # stacked Q/K/V weights (bf16)
        layer_spec((3, 1, H)),           # stacked Q/K/V biases
        layer_spec((H, H)),              # attention output weight (bf16)
        layer_spec((1, H)),              # attention output bias
        layer_spec((1, H)),              # attention LN gamma
        layer_spec((1, H)),              # attention LN beta
        layer_spec((H, I)),              # intermediate weight (bf16)
        layer_spec((1, I)),              # intermediate bias
        layer_spec((I, H)),              # FFN output weight (bf16)
        layer_spec((1, H)),              # FFN output bias
        layer_spec((1, H)),              # output LN gamma
        layer_spec((1, H)),              # output LN beta
        const_spec((H, LANE)),           # classifier weight (lane-dense, bf16)
        const_spec((1, LANE)),           # classifier bias (lane-dense)
    ]
    args = [
        emb, ext_mask, params["emb_ln_g"], params["emb_ln_b"],
        params["w_qkv"], params["b_qkv"], params["w_ao"], params["b_ao"],
        params["aln_g"], params["aln_b"], params["w_i"], params["b_i"],
        params["w_o"], params["b_o"], params["oln_g"], params["oln_b"],
        params["cls_w"], params["cls_b"],
    ]

    if with_labels:
        in_specs.append(batch_spec((S, 1)))
        args.append(labels.reshape(B, S, 1).astype(jnp.int32))
        # per-batch CE partial sum; logits never leave VMEM
        out_shape = jax.ShapeDtypeStruct((B, 1, 1), jnp.float32)
        out_spec = batch_spec((1, 1))
    else:
        # lane-dense padded logits slab; sliced back to C outside the kernel
        out_shape = jax.ShapeDtypeStruct((B, S, LANE), jnp.float32)
        out_spec = batch_spec((S, LANE))

    kernel = functools.partial(_bert_forward_kernel, S, H, Hh, dh, C,
                               with_labels)

    out = pl.pallas_call(
        kernel,
        out_shape=out_shape,
        grid=(B, L),
        in_specs=in_specs,
        out_specs=out_spec,
        scratch_shapes=[
            pltpu.VMEM((S, H), jnp.float32),   # resident activations (layer carry)
            pltpu.VMEM((S, H), jnp.float32),   # per-head attention context
        ],
        compiler_params=pltpu.CompilerParams(
            # batch axis is independent -> shard across v7x's 2 TensorCores;
            # layer axis carries state through the VMEM scratch -> sequential.
            dimension_semantics=("parallel", "arbitrary"),
            vmem_limit_bytes=48 * 1024 * 1024,
        ),
    )(*args)

    if with_labels:
        # CrossEntropyLoss() default: mean over all B*S tokens.
        return jnp.sum(out[:, 0, 0]) / jnp.float32(M)
    return out[:, :, :C].reshape(M, C)


# ----------------------------------------------------------------------------
# Main
# ----------------------------------------------------------------------------

if __name__ == "__main__":
    key = jax.random.PRNGKey(0)
    k_param, k_ids, k_lbl = jax.random.split(key, 3)

    params = init_params(k_param, CFG)

    B, S = CFG["batch"], CFG["seq"]
    input_ids = jax.random.randint(k_ids, (B, S), 0, CFG["vocab_size"],
                                   dtype=jnp.int32)
    token_type_ids = jnp.zeros((B, S), dtype=jnp.int32)
    attention_mask = jnp.ones((B, S), dtype=jnp.int32)
    labels = jax.random.randint(k_lbl, (B, S), 0, CFG["num_labels"],
                                dtype=jnp.int32)

    fwd_logits = jax.jit(
        lambda p, ii, tt, am: bert_tagger_forward(p, ii, tt, am))
    fwd_loss = jax.jit(
        lambda p, ii, tt, am, lb: bert_tagger_forward(p, ii, tt, am, labels=lb))

    # labels=None branch -> logits of shape (B*S, num_labels)
    logits = fwd_logits(params, input_ids, token_type_ids, attention_mask)
    jax.block_until_ready(logits)
    assert logits.shape == (B * S, CFG["num_labels"])
    assert bool(jnp.all(jnp.isfinite(logits)))

    # labels branch -> scalar cross-entropy loss
    loss = fwd_loss(params, input_ids, token_type_ids, attention_mask, labels)
    jax.block_until_ready(loss)
    assert loss.shape == ()
    assert bool(jnp.isfinite(loss))

    print("KERNEL_OK")
</pallas_src>

<mosaic_0001>
module attributes {stable_mosaic.version = 11 : i64} {
  func.func @_bert_forward_kernel(%arg0: i32, %arg1: i32, %arg2: memref<1x8x32xf32, #tpu.memory_space<vmem>>, %arg3: memref<1x1x8xf32, #tpu.memory_space<vmem>>, %arg4: memref<1x32xf32, #tpu.memory_space<vmem>>, %arg5: memref<1x32xf32, #tpu.memory_space<vmem>>, %arg6: memref<1x3x32x32xbf16, #tpu.memory_space<vmem>>, %arg7: memref<1x3x1x32xf32, #tpu.memory_space<vmem>>, %arg8: memref<1x32x32xbf16, #tpu.memory_space<vmem>>, %arg9: memref<1x1x32xf32, #tpu.memory_space<vmem>>, %arg10: memref<1x1x32xf32, #tpu.memory_space<vmem>>, %arg11: memref<1x1x32xf32, #tpu.memory_space<vmem>>, %arg12: memref<1x32x64xbf16, #tpu.memory_space<vmem>>, %arg13: memref<1x1x64xf32, #tpu.memory_space<vmem>>, %arg14: memref<1x64x32xbf16, #tpu.memory_space<vmem>>, %arg15: memref<1x1x32xf32, #tpu.memory_space<vmem>>, %arg16: memref<1x1x32xf32, #tpu.memory_space<vmem>>, %arg17: memref<1x1x32xf32, #tpu.memory_space<vmem>>, %arg18: memref<32x128xbf16, #tpu.memory_space<vmem>>, %arg19: memref<1x128xf32, #tpu.memory_space<vmem>>, %arg20: memref<1x8x128xf32, #tpu.memory_space<vmem>>, %arg21: memref<8x32xf32, #tpu.memory_space<vmem>>, %arg22: memref<8x32xf32, #tpu.memory_space<vmem>>) attributes {dimension_semantics = [#tpu.dimension_semantics<parallel>, #tpu.dimension_semantics<arbitrary>], iteration_bounds = array<i64: 2, 2>, scalar_prefetch = 0 : i64, scratch_operands = 2 : i64, tpu.core_type = #tpu.core_type<tc>, window_params = [{transform_indices = @transform_0, window_bounds = array<i64: 1, 8, 32>}, {transform_indices = @transform_1, window_bounds = array<i64: 1, 1, 8>}, {pipeline_mode = #tpu.pipeline_mode<synchronous>, transform_indices = @transform_2, window_bounds = array<i64: 1, 32>}, {pipeline_mode = #tpu.pipeline_mode<synchronous>, transform_indices = @transform_3, window_bounds = array<i64: 1, 32>}, {transform_indices = @transform_4, window_bounds = array<i64: 1, 3, 32, 32>}, {transform_indices = @transform_5, window_bounds = array<i64: 1, 3, 1, 32>}, {transform_indices = @transform_6, window_bounds = array<i64: 1, 32, 32>}, {transform_indices = @transform_7, window_bounds = array<i64: 1, 1, 32>}, {transform_indices = @transform_8, window_bounds = array<i64: 1, 1, 32>}, {transform_indices = @transform_9, window_bounds = array<i64: 1, 1, 32>}, {transform_indices = @transform_10, window_bounds = array<i64: 1, 32, 64>}, {transform_indices = @transform_11, window_bounds = array<i64: 1, 1, 64>}, {transform_indices = @transform_12, window_bounds = array<i64: 1, 64, 32>}, {transform_indices = @transform_13, window_bounds = array<i64: 1, 1, 32>}, {transform_indices = @transform_14, window_bounds = array<i64: 1, 1, 32>}, {transform_indices = @transform_15, window_bounds = array<i64: 1, 1, 32>}, {pipeline_mode = #tpu.pipeline_mode<synchronous>, transform_indices = @transform_16, window_bounds = array<i64: 32, 128>}, {pipeline_mode = #tpu.pipeline_mode<synchronous>, transform_indices = @transform_17, window_bounds = array<i64: 1, 128>}, {transform_indices = @transform_18, window_bounds = array<i64: 1, 8, 128>}]} {
    %c0_i32 = arith.constant 0 : i32
    %0 = arith.cmpi eq, %arg1, %c0_i32 : i32
    %1 = arith.extui %0 : i1 to i32
    %c0_i32_0 = arith.constant 0 : i32
    %2 = arith.cmpi ne, %1, %c0_i32_0 : i32
    scf.if %2 {
      %c0_105 = arith.constant 0 : index
      %c0_106 = arith.constant 0 : index
      %c0_107 = arith.constant 0 : index
      %215 = vector.load %arg2[%c0_105, %c0_106, %c0_107] : memref<1x8x32xf32, #tpu.memory_space<vmem>>, vector<1x8x32xf32>
      %216 = vector.shape_cast %215 : vector<1x8x32xf32> to vector<8x32xf32>
      %c0_108 = arith.constant 0 : index
      %c0_109 = arith.constant 0 : index
      %217 = vector.load %arg4[%c0_108, %c0_109] : memref<1x32xf32, #tpu.memory_space<vmem>>, vector<1x32xf32>
      %c0_110 = arith.constant 0 : index
      %c0_111 = arith.constant 0 : index
      %218 = vector.load %arg5[%c0_110, %c0_111] : memref<1x32xf32, #tpu.memory_space<vmem>>, vector<1x32xf32>
      %cst_112 = arith.constant dense<0.000000e+00> : vector<8xf32>
      %219 = vector.multi_reduction <add>, %216, %cst_112 [1] : vector<8x32xf32> to vector<8xf32>
      %220 = vector.shape_cast %219 : vector<8xf32> to vector<8x1xf32>
      %cst_113 = arith.constant 3.200000e+01 : f32
      %221 = vector.broadcast %cst_113 : f32 to vector<8x1xf32>
      %222 = arith.divf %220, %221 : vector<8x1xf32>
      %223 = vector.broadcast %222 : vector<8x1xf32> to vector<8x32xf32>
      %224 = arith.subf %216, %223 : vector<8x32xf32>
      %225 = arith.mulf %224, %224 : vector<8x32xf32>
      %cst_114 = arith.constant dense<0.000000e+00> : vector<8xf32>
      %226 = vector.multi_reduction <add>, %225, %cst_114 [1] : vector<8x32xf32> to vector<8xf32>
      %227 = vector.shape_cast %226 : vector<8xf32> to vector<8x1xf32>
      %cst_115 = arith.constant 3.200000e+01 : f32
      %228 = vector.broadcast %cst_115 : f32 to vector<8x1xf32>
      %229 = arith.divf %227, %228 : vector<8x1xf32>
      %230 = vector.broadcast %222 : vector<8x1xf32> to vector<8x32xf32>
      %231 = arith.subf %216, %230 : vector<8x32xf32>
      %cst_116 = arith.constant 9.99999996E-13 : f32
      %232 = vector.broadcast %cst_116 : f32 to vector<8x1xf32>
      %233 = arith.addf %229, %232 : vector<8x1xf32>
      %234 = math.rsqrt %233 : vector<8x1xf32>
      %235 = vector.broadcast %234 : vector<8x1xf32> to vector<8x32xf32>
      %236 = arith.mulf %231, %235 : vector<8x32xf32>
      %237 = vector.broadcast %217 : vector<1x32xf32> to vector<8x32xf32>
      %238 = arith.mulf %236, %237 : vector<8x32xf32>
      %239 = vector.broadcast %218 : vector<1x32xf32> to vector<8x32xf32>
      %240 = arith.addf %238, %239 : vector<8x32xf32>
      %c0_117 = arith.constant 0 : index
      %c0_118 = arith.constant 0 : index
      %241 = vector.load %arg21[%c0_117, %c0_118] : memref<8x32xf32, #tpu.memory_space<vmem>>, vector<8x32xf32>
      tpu.vector_store %arg21[%c0_117, %c0_118], %240 {strides = array<i32>} : memref<8x32xf32, #tpu.memory_space<vmem>>, vector<8x32xf32>,
    } else {
    }
    %c0 = arith.constant 0 : index
    %c0_1 = arith.constant 0 : index
    %3 = vector.load %arg21[%c0, %c0_1] : memref<8x32xf32, #tpu.memory_space<vmem>>, vector<8x32xf32>
    %4 = arith.truncf %3 : vector<8x32xf32> to vector<8x32xbf16>
    %c0_2 = arith.constant 0 : index
    %c0_3 = arith.constant 0 : index
    %c0_4 = arith.constant 0 : index
    %c0_5 = arith.constant 0 : index
    %5 = vector.load %arg6[%c0_2, %c0_3, %c0_4, %c0_5] : memref<1x3x32x32xbf16, #tpu.memory_space<vmem>>, vector<1x1x32x32xbf16>
    %6 = vector.shape_cast %5 : vector<1x1x32x32xbf16> to vector<32x32xbf16>
    %cst = arith.constant dense<0.000000e+00> : vector<8x32xf32>
    %7 = tpu.matmul %4, %6, %cst {dimension_numbers = #tpu.dot_dimension_numbers<[1], [0], [0], [1], [0, 0, 1, 1], [], []>} : vector<8x32xbf16>, vector<32x32xbf16>, vector<8x32xf32> -> vector<8x32xf32>
    %c0_6 = arith.constant 0 : index
    %c0_7 = arith.constant 0 : index
    %c0_8 = arith.constant 0 : index
    %c0_9 = arith.constant 0 : index
    %8 = vector.load %arg7[%c0_6, %c0_7, %c0_8, %c0_9] : memref<1x3x1x32xf32, #tpu.memory_space<vmem>>, vector<1x1x1x32xf32>
    %9 = vector.shape_cast %8 : vector<1x1x1x32xf32> to vector<1x32xf32>
    %10 = vector.broadcast %9 : vector<1x32xf32> to vector<8x32xf32>
    %11 = arith.addf %7, %10 : vector<8x32xf32>
    %c0_10 = arith.constant 0 : index
    %c1 = arith.constant 1 : index
    %c0_11 = arith.constant 0 : index
    %c0_12 = arith.constant 0 : index
    %12 = vector.load %arg6[%c0_10, %c1, %c0_11, %c0_12] : memref<1x3x32x32xbf16, #tpu.memory_space<vmem>>, vector<1x1x32x32xbf16>
    %13 = vector.shape_cast %12 : vector<1x1x32x32xbf16> to vector<32x32xbf16>
    %cst_13 = arith.constant dense<0.000000e+00> : vector<8x32xf32>
    %14 = tpu.matmul %4, %13, %cst_13 {dimension_numbers = #tpu.dot_dimension_numbers<[1], [0], [0], [1], [0, 0, 1, 1], [], []>} : vector<8x32xbf16>, vector<32x32xbf16>, vector<8x32xf32> -> vector<8x32xf32>
    %c0_14 = arith.constant 0 : index
    %c1_15 = arith.constant 1 : index
    %c0_16 = arith.constant 0 : index
    %c0_17 = arith.constant 0 : index
    %15 = vector.load %arg7[%c0_14, %c1_15, %c0_16, %c0_17] : memref<1x3x1x32xf32, #tpu.memory_space<vmem>>, vector<1x1x1x32xf32>
    %16 = vector.shape_cast %15 : vector<1x1x1x32xf32> to vector<1x32xf32>
    %17 = vector.broadcast %16 : vector<1x32xf32> to vector<8x32xf32>
    %18 = arith.addf %14, %17 : vector<8x32xf32>
    %c0_18 = arith.constant 0 : index
    %c2 = arith.constant 2 : index
    %c0_19 = arith.constant 0 : index
    %c0_20 = arith.constant 0 : index
    %19 = vector.load %arg6[%c0_18, %c2, %c0_19, %c0_20] : memref<1x3x32x32xbf16, #tpu.memory_space<vmem>>, vector<1x1x32x32xbf16>
    %20 = vector.shape_cast %19 : vector<1x1x32x32xbf16> to vector<32x32xbf16>
    %cst_21 = arith.constant dense<0.000000e+00> : vector<8x32xf32>
    %21 = tpu.matmul %4, %20, %cst_21 {dimension_numbers = #tpu.dot_dimension_numbers<[1], [0], [0], [1], [0, 0, 1, 1], [], []>} : vector<8x32xbf16>, vector<32x32xbf16>, vector<8x32xf32> -> vector<8x32xf32>
    %c0_22 = arith.constant 0 : index
    %c2_23 = arith.constant 2 : index
    %c0_24 = arith.constant 0 : index
    %c0_25 = arith.constant 0 : index
    %22 = vector.load %arg7[%c0_22, %c2_23, %c0_24, %c0_25] : memref<1x3x1x32xf32, #tpu.memory_space<vmem>>, vector<1x1x1x32xf32>
    %23 = vector.shape_cast %22 : vector<1x1x1x32xf32> to vector<1x32xf32>
    %24 = vector.broadcast %23 : vector<1x32xf32> to vector<8x32xf32>
    %25 = arith.addf %21, %24 : vector<8x32xf32>
    %c0_26 = arith.constant 0 : index
    %c0_27 = arith.constant 0 : index
    %c0_28 = arith.constant 0 : index
    %26 = vector.load %arg3[%c0_26, %c0_27, %c0_28] : memref<1x1x8xf32, #tpu.memory_space<vmem>>, vector<1x1x8xf32>
    %27 = vector.shape_cast %26 : vector<1x1x8xf32> to vector<1x8xf32>
    %28 = vector.extract_strided_slice %11 {offsets = [0, 0], sizes = [8, 8], strides = [1, 1]} : vector<8x32xf32> to vector<8x8xf32>
    %29 = arith.truncf %28 : vector<8x8xf32> to vector<8x8xbf16>
    %30 = vector.extract_strided_slice %18 {offsets = [0, 0], sizes = [8, 8], strides = [1, 1]} : vector<8x32xf32> to vector<8x8xf32>
    %31 = arith.truncf %30 : vector<8x8xf32> to vector<8x8xbf16>
    %32 = vector.extract_strided_slice %25 {offsets = [0, 0], sizes = [8, 8], strides = [1, 1]} : vector<8x32xf32> to vector<8x8xf32>
    %33 = arith.truncf %32 : vector<8x8xf32> to vector<8x8xbf16>
    %cst_29 = arith.constant dense<0.000000e+00> : vector<8x8xf32>
    %34 = tpu.matmul %29, %31, %cst_29 {dimension_numbers = #tpu.dot_dimension_numbers<[1], [1], [0], [0], [0, 0, 1, 0], [], []>} : vector<8x8xbf16>, vector<8x8xbf16>, vector<8x8xf32> -> vector<8x8xf32>
    %cst_30 = arith.constant 0.353553385 : f32
    %35 = vector.broadcast %cst_30 : f32 to vector<8x8xf32>
    %36 = arith.mulf %34, %35 : vector<8x8xf32>
    %37 = vector.broadcast %27 : vector<1x8xf32> to vector<8x8xf32>
    %38 = arith.addf %36, %37 : vector<8x8xf32>
    %cst_31 = arith.constant dense<0xFF800000> : vector<8xf32>
    %39 = vector.multi_reduction <maximumf>, %38, %cst_31 [1] : vector<8x8xf32> to vector<8xf32>
    %40 = vector.shape_cast %39 : vector<8xf32> to vector<8x1xf32>
    %41 = vector.broadcast %40 : vector<8x1xf32> to vector<8x8xf32>
    %42 = arith.subf %38, %41 : vector<8x8xf32>
    %43 = math.exp %42 : vector<8x8xf32>
    %cst_32 = arith.constant dense<0.000000e+00> : vector<8xf32>
    %44 = vector.multi_reduction <add>, %43, %cst_32 [1] : vector<8x8xf32> to vector<8xf32>
    %45 = vector.shape_cast %44 : vector<8xf32> to vector<8x1xf32>
    %46 = tpu.reciprocal %45 {approx = true} : vector<8x1xf32> -> vector<8x1xf32>
    %47 = vector.broadcast %46 : vector<8x1xf32> to vector<8x8xf32>
    %48 = arith.mulf %43, %47 : vector<8x8xf32>
    %49 = arith.truncf %48 : vector<8x8xf32> to vector<8x8xbf16>
    %cst_33 = arith.constant dense<0.000000e+00> : vector<8x8xf32>
    %50 = tpu.matmul %49, %33, %cst_33 {dimension_numbers = #tpu.dot_dimension_numbers<[1], [0], [0], [1], [0, 0, 1, 1], [], []>} : vector<8x8xbf16>, vector<8x8xbf16>, vector<8x8xf32> -> vector<8x8xf32>
    %c0_34 = arith.constant 0 : index
    %c0_35 = arith.constant 0 : index
    %51 = vector.load %arg22[%c0_34, %c0_35] : memref<8x32xf32, #tpu.memory_space<vmem>>, vector<8x8xf32>
    tpu.vector_store %arg22[%c0_34, %c0_35], %50 {strides = array<i32>} : memref<8x32xf32, #tpu.memory_space<vmem>>, vector<8x8xf32>,
    %52 = vector.extract_strided_slice %11 {offsets = [0, 8], sizes = [8, 8], strides = [1, 1]} : vector<8x32xf32> to vector<8x8xf32>
    %53 = arith.truncf %52 : vector<8x8xf32> to vector<8x8xbf16>
    %54 = vector.extract_strided_slice %18 {offsets = [0, 8], sizes = [8, 8], strides = [1, 1]} : vector<8x32xf32> to vector<8x8xf32>
    %55 = arith.truncf %54 : vector<8x8xf32> to vector<8x8xbf16>
    %56 = vector.extract_strided_slice %25 {offsets = [0, 8], sizes = [8, 8], strides = [1, 1]} : vector<8x32xf32> to vector<8x8xf32>
    %57 = arith.truncf %56 : vector<8x8xf32> to vector<8x8xbf16>
    %cst_36 = arith.constant dense<0.000000e+00> : vector<8x8xf32>
    %58 = tpu.matmul %53, %55, %cst_36 {dimension_numbers = #tpu.dot_dimension_numbers<[1], [1], [0], [0], [0, 0, 1, 0], [], []>} : vector<8x8xbf16>, vector<8x8xbf16>, vector<8x8xf32> -> vector<8x8xf32>
    %cst_37 = arith.constant 0.353553385 : f32
    %59 = vector.broadcast %cst_37 : f32 to vector<8x8xf32>
    %60 = arith.mulf %58, %59 : vector<8x8xf32>
    %61 = vector.broadcast %27 : vector<1x8xf32> to vector<8x8xf32>
    %62 = arith.addf %60, %61 : vector<8x8xf32>
    %cst_38 = arith.constant dense<0xFF800000> : vector<8xf32>
    %63 = vector.multi_reduction <maximumf>, %62, %cst_38 [1] : vector<8x8xf32> to vector<8xf32>
    %64 = vector.shape_cast %63 : vector<8xf32> to vector<8x1xf32>
    %65 = vector.broadcast %64 : vector<8x1xf32> to vector<8x8xf32>
    %66 = arith.subf %62, %65 : vector<8x8xf32>
    %67 = math.exp %66 : vector<8x8xf32>
    %cst_39 = arith.constant dense<0.000000e+00> : vector<8xf32>
    %68 = vector.multi_reduction <add>, %67, %cst_39 [1] : vector<8x8xf32> to vector<8xf32>
    %69 = vector.shape_cast %68 : vector<8xf32> to vector<8x1xf32>
    %70 = tpu.reciprocal %69 {approx = true} : vector<8x1xf32> -> vector<8x1xf32>
    %71 = vector.broadcast %70 : vector<8x1xf32> to vector<8x8xf32>
    %72 = arith.mulf %67, %71 : vector<8x8xf32>
    %73 = arith.truncf %72 : vector<8x8xf32> to vector<8x8xbf16>
    %cst_40 = arith.constant dense<0.000000e+00> : vector<8x8xf32>
    %74 = tpu.matmul %73, %57, %cst_40 {dimension_numbers = #tpu.dot_dimension_numbers<[1], [0], [0], [1], [0, 0, 1, 1], [], []>} : vector<8x8xbf16>, vector<8x8xbf16>, vector<8x8xf32> -> vector<8x8xf32>
    %c0_41 = arith.constant 0 : index
    %c8 = arith.constant 8 : index
    %75 = vector.load %arg22[%c0_41, %c8] : memref<8x32xf32, #tpu.memory_space<vmem>>, vector<8x8xf32>
    tpu.vector_store %arg22[%c0_41, %c8], %74 {strides = array<i32>} : memref<8x32xf32, #tpu.memory_space<vmem>>, vector<8x8xf32>,
    %76 = vector.extract_strided_slice %11 {offsets = [0, 16], sizes = [8, 8], strides = [1, 1]} : vector<8x32xf32> to vector<8x8xf32>
    %77 = arith.truncf %76 : vector<8x8xf32> to vector<8x8xbf16>
    %78 = vector.extract_strided_slice %18 {offsets = [0, 16], sizes = [8, 8], strides = [1, 1]} : vector<8x32xf32> to vector<8x8xf32>
    %79 = arith.truncf %78 : vector<8x8xf32> to vector<8x8xbf16>
    %80 = vector.extract_strided_slice %25 {offsets = [0, 16], sizes = [8, 8], strides = [1, 1]} : vector<8x32xf32> to vector<8x8xf32>
    %81 = arith.truncf %80 : vector<8x8xf32> to vector<8x8xbf16>
    %cst_42 = arith.constant dense<0.000000e+00> : vector<8x8xf32>
    %82 = tpu.matmul %77, %79, %cst_42 {dimension_numbers = #tpu.dot_dimension_numbers<[1], [1], [0], [0], [0, 0, 1, 0], [], []>} : vector<8x8xbf16>, vector<8x8xbf16>, vector<8x8xf32> -> vector<8x8xf32>
    %cst_43 = arith.constant 0.353553385 : f32
    %83 = vector.broadcast %cst_43 : f32 to vector<8x8xf32>
    %84 = arith.mulf %82, %83 : vector<8x8xf32>
    %85 = vector.broadcast %27 : vector<1x8xf32> to vector<8x8xf32>
    %86 = arith.addf %84, %85 : vector<8x8xf32>
    %cst_44 = arith.constant dense<0xFF800000> : vector<8xf32>
    %87 = vector.multi_reduction <maximumf>, %86, %cst_44 [1] : vector<8x8xf32> to vector<8xf32>
    %88 = vector.shape_cast %87 : vector<8xf32> to vector<8x1xf32>
    %89 = vector.broadcast %88 : vector<8x1xf32> to vector<8x8xf32>
    %90 = arith.subf %86, %89 : vector<8x8xf32>
    %91 = math.exp %90 : vector<8x8xf32>
    %cst_45 = arith.constant dense<0.000000e+00> : vector<8xf32>
    %92 = vector.multi_reduction <add>, %91, %cst_45 [1] : vector<8x8xf32> to vector<8xf32>
    %93 = vector.shape_cast %92 : vector<8xf32> to vector<8x1xf32>
    %94 = tpu.reciprocal %93 {approx = true} : vector<8x1xf32> -> vector<8x1xf32>
    %95 = vector.broadcast %94 : vector<8x1xf32> to vector<8x8xf32>
    %96 = arith.mulf %91, %95 : vector<8x8xf32>
    %97 = arith.truncf %96 : vector<8x8xf32> to vector<8x8xbf16>
    %cst_46 = arith.constant dense<0.000000e+00> : vector<8x8xf32>
    %98 = tpu.matmul %97, %81, %cst_46 {dimension_numbers = #tpu.dot_dimension_numbers<[1], [0], [0], [1], [0, 0, 1, 1], [], []>} : vector<8x8xbf16>, vector<8x8xbf16>, vector<8x8xf32> -> vector<8x8xf32>
    %c0_47 = arith.constant 0 : index
    %c16 = arith.constant 16 : index
    %99 = vector.load %arg22[%c0_47, %c16] : memref<8x32xf32, #tpu.memory_space<vmem>>, vector<8x8xf32>
    tpu.vector_store %arg22[%c0_47, %c16], %98 {strides = array<i32>} : memref<8x32xf32, #tpu.memory_space<vmem>>, vector<8x8xf32>,
    %100 = vector.extract_strided_slice %11 {offsets = [0, 24], sizes = [8, 8], strides = [1, 1]} : vector<8x32xf32> to vector<8x8xf32>
    %101 = arith.truncf %100 : vector<8x8xf32> to vector<8x8xbf16>
    %102 = vector.extract_strided_slice %18 {offsets = [0, 24], sizes = [8, 8], strides = [1, 1]} : vector<8x32xf32> to vector<8x8xf32>
    %103 = arith.truncf %102 : vector<8x8xf32> to vector<8x8xbf16>
    %104 = vector.extract_strided_slice %25 {offsets = [0, 24], sizes = [8, 8], strides = [1, 1]} : vector<8x32xf32> to vector<8x8xf32>
    %105 = arith.truncf %104 : vector<8x8xf32> to vector<8x8xbf16>
    %cst_48 = arith.constant dense<0.000000e+00> : vector<8x8xf32>
    %106 = tpu.matmul %101, %103, %cst_48 {dimension_numbers = #tpu.dot_dimension_numbers<[1], [1], [0], [0], [0, 0, 1, 0], [], []>} : vector<8x8xbf16>, vector<8x8xbf16>, vector<8x8xf32> -> vector<8x8xf32>
    %cst_49 = arith.constant 0.353553385 : f32
    %107 = vector.broadcast %cst_49 : f32 to vector<8x8xf32>
    %108 = arith.mulf %106, %107 : vector<8x8xf32>
    %109 = vector.broadcast %27 : vector<1x8xf32> to vector<8x8xf32>
    %110 = arith.addf %108, %109 : vector<8x8xf32>
    %cst_50 = arith.constant dense<0xFF800000> : vector<8xf32>
    %111 = vector.multi_reduction <maximumf>, %110, %cst_50 [1] : vector<8x8xf32> to vector<8xf32>
    %112 = vector.shape_cast %111 : vector<8xf32> to vector<8x1xf32>
    %113 = vector.broadcast %112 : vector<8x1xf32> to vector<8x8xf32>
    %114 = arith.subf %110, %113 : vector<8x8xf32>
    %115 = math.exp %114 : vector<8x8xf32>
    %cst_51 = arith.constant dense<0.000000e+00> : vector<8xf32>
    %116 = vector.multi_reduction <add>, %115, %cst_51 [1] : vector<8x8xf32> to vector<8xf32>
    %117 = vector.shape_cast %116 : vector<8xf32> to vector<8x1xf32>
    %118 = tpu.reciprocal %117 {approx = true} : vector<8x1xf32> -> vector<8x1xf32>
    %119 = vector.broadcast %118 : vector<8x1xf32> to vector<8x8xf32>
    %120 = arith.mulf %115, %119 : vector<8x8xf32>
    %121 = arith.truncf %120 : vector<8x8xf32> to vector<8x8xbf16>
    %cst_52 = arith.constant dense<0.000000e+00> : vector<8x8xf32>
    %122 = tpu.matmul %121, %105, %cst_52 {dimension_numbers = #tpu.dot_dimension_numbers<[1], [0], [0], [1], [0, 0, 1, 1], [], []>} : vector<8x8xbf16>, vector<8x8xbf16>, vector<8x8xf32> -> vector<8x8xf32>
    %c0_53 = arith.constant 0 : index
    %c24 = arith.constant 24 : index
    %123 = vector.load %arg22[%c0_53, %c24] : memref<8x32xf32, #tpu.memory_space<vmem>>, vector<8x8xf32>
    tpu.vector_store %arg22[%c0_53, %c24], %122 {strides = array<i32>} : memref<8x32xf32, #tpu.memory_space<vmem>>, vector<8x8xf32>,
    %c0_54 = arith.constant 0 : index
    %c0_55 = arith.constant 0 : index
    %124 = vector.load %arg22[%c0_54, %c0_55] : memref<8x32xf32, #tpu.memory_space<vmem>>, vector<8x32xf32>
    %125 = arith.truncf %124 : vector<8x32xf32> to vector<8x32xbf16>
    %c0_56 = arith.constant 0 : index
    %c0_57 = arith.constant 0 : index
    %c0_58 = arith.constant 0 : index
    %126 = vector.load %arg8[%c0_56, %c0_57, %c0_58] : memref<1x32x32xbf16, #tpu.memory_space<vmem>>, vector<1x32x32xbf16>
    %127 = vector.shape_cast %126 : vector<1x32x32xbf16> to vector<32x32xbf16>
    %cst_59 = arith.constant dense<0.000000e+00> : vector<8x32xf32>
    %128 = tpu.matmul %125, %127, %cst_59 {dimension_numbers = #tpu.dot_dimension_numbers<[1], [0], [0], [1], [0, 0, 1, 1], [], []>} : vector<8x32xbf16>, vector<32x32xbf16>, vector<8x32xf32> -> vector<8x32xf32>
    %c0_60 = arith.constant 0 : index
    %c0_61 = arith.constant 0 : index
    %c0_62 = arith.constant 0 : index
    %129 = vector.load %arg9[%c0_60, %c0_61, %c0_62] : memref<1x1x32xf32, #tpu.memory_space<vmem>>, vector<1x1x32xf32>
    %130 = vector.shape_cast %129 : vector<1x1x32xf32> to vector<1x32xf32>
    %131 = vector.broadcast %130 : vector<1x32xf32> to vector<8x32xf32>
    %132 = arith.addf %128, %131 : vector<8x32xf32>
    %133 = arith.addf %132, %3 : vector<8x32xf32>
    %c0_63 = arith.constant 0 : index
    %c0_64 = arith.constant 0 : index
    %c0_65 = arith.constant 0 : index
    %134 = vector.load %arg10[%c0_63, %c0_64, %c0_65] : memref<1x1x32xf32, #tpu.memory_space<vmem>>, vector<1x1x32xf32>
    %135 = vector.shape_cast %134 : vector<1x1x32xf32> to vector<1x32xf32>
    %c0_66 = arith.constant 0 : index
    %c0_67 = arith.constant 0 : index
    %c0_68 = arith.constant 0 : index
    %136 = vector.load %arg11[%c0_66, %c0_67, %c0_68] : memref<1x1x32xf32, #tpu.memory_space<vmem>>, vector<1x1x32xf32>
    %137 = vector.shape_cast %136 : vector<1x1x32xf32> to vector<1x32xf32>
    %cst_69 = arith.constant dense<0.000000e+00> : vector<8xf32>
    %138 = vector.multi_reduction <add>, %133, %cst_69 [1] : vector<8x32xf32> to vector<8xf32>
    %139 = vector.shape_cast %138 : vector<8xf32> to vector<8x1xf32>
    %cst_70 = arith.constant 3.200000e+01 : f32
    %140 = vector.broadcast %cst_70 : f32 to vector<8x1xf32>
    %141 = arith.divf %139, %140 : vector<8x1xf32>
    %142 = vector.broadcast %141 : vector<8x1xf32> to vector<8x32xf32>
    %143 = arith.subf %133, %142 : vector<8x32xf32>
    %144 = arith.mulf %143, %143 : vector<8x32xf32>
    %cst_71 = arith.constant dense<0.000000e+00> : vector<8xf32>
    %145 = vector.multi_reduction <add>, %144, %cst_71 [1] : vector<8x32xf32> to vector<8xf32>
    %146 = vector.shape_cast %145 : vector<8xf32> to vector<8x1xf32>
    %cst_72 = arith.constant 3.200000e+01 : f32
    %147 = vector.broadcast %cst_72 : f32 to vector<8x1xf32>
    %148 = arith.divf %146, %147 : vector<8x1xf32>
    %149 = vector.broadcast %141 : vector<8x1xf32> to vector<8x32xf32>
    %150 = arith.subf %133, %149 : vector<8x32xf32>
    %cst_73 = arith.constant 9.99999996E-13 : f32
    %151 = vector.broadcast %cst_73 : f32 to vector<8x1xf32>
    %152 = arith.addf %148, %151 : vector<8x1xf32>
    %153 = math.rsqrt %152 : vector<8x1xf32>
    %154 = vector.broadcast %153 : vector<8x1xf32> to vector<8x32xf32>
    %155 = arith.mulf %150, %154 : vector<8x32xf32>
    %156 = vector.broadcast %135 : vector<1x32xf32> to vector<8x32xf32>
    %157 = arith.mulf %155, %156 : vector<8x32xf32>
    %158 = vector.broadcast %137 : vector<1x32xf32> to vector<8x32xf32>
    %159 = arith.addf %157, %158 : vector<8x32xf32>
    %160 = arith.truncf %159 : vector<8x32xf32> to vector<8x32xbf16>
    %c0_74 = arith.constant 0 : index
    %c0_75 = arith.constant 0 : index
    %c0_76 = arith.constant 0 : index
    %161 = vector.load %arg12[%c0_74, %c0_75, %c0_76] : memref<1x32x64xbf16, #tpu.memory_space<vmem>>, vector<1x32x64xbf16>
    %162 = vector.shape_cast %161 : vector<1x32x64xbf16> to vector<32x64xbf16>
    %cst_77 = arith.constant dense<0.000000e+00> : vector<8x64xf32>
    %163 = tpu.matmul %160, %162, %cst_77 {dimension_numbers = #tpu.dot_dimension_numbers<[1], [0], [0], [1], [0, 0, 1, 1], [], []>} : vector<8x32xbf16>, vector<32x64xbf16>, vector<8x64xf32> -> vector<8x64xf32>
    %c0_78 = arith.constant 0 : index
    %c0_79 = arith.constant 0 : index
    %c0_80 = arith.constant 0 : index
    %164 = vector.load %arg13[%c0_78, %c0_79, %c0_80] : memref<1x1x64xf32, #tpu.memory_space<vmem>>, vector<1x1x64xf32>
    %165 = vector.shape_cast %164 : vector<1x1x64xf32> to vector<1x64xf32>
    %166 = vector.broadcast %165 : vector<1x64xf32> to vector<8x64xf32>
    %167 = arith.addf %163, %166 : vector<8x64xf32>
    %cst_81 = arith.constant 5.000000e-01 : f32
    %168 = vector.broadcast %cst_81 : f32 to vector<8x64xf32>
    %169 = arith.mulf %167, %168 : vector<8x64xf32>
    %cst_82 = arith.constant 0.707106769 : f32
    %170 = vector.broadcast %cst_82 : f32 to vector<8x64xf32>
    %171 = arith.mulf %167, %170 : vector<8x64xf32>
    %172 = math.erf %171 : vector<8x64xf32>
    %cst_83 = arith.constant 1.000000e+00 : f32
    %173 = vector.broadcast %cst_83 : f32 to vector<8x64xf32>
    %174 = arith.addf %173, %172 : vector<8x64xf32>
    %175 = arith.mulf %169, %174 : vector<8x64xf32>
    %176 = arith.truncf %175 : vector<8x64xf32> to vector<8x64xbf16>
    %c0_84 = arith.constant 0 : index
    %c0_85 = arith.constant 0 : index
    %c0_86 = arith.constant 0 : index
    %177 = vector.load %arg14[%c0_84, %c0_85, %c0_86] : memref<1x64x32xbf16, #tpu.memory_space<vmem>>, vector<1x64x32xbf16>
    %178 = vector.shape_cast %177 : vector<1x64x32xbf16> to vector<64x32xbf16>
    %cst_87 = arith.constant dense<0.000000e+00> : vector<8x32xf32>
    %179 = tpu.matmul %176, %178, %cst_87 {dimension_numbers = #tpu.dot_dimension_numbers<[1], [0], [0], [1], [0, 0, 1, 1], [], []>} : vector<8x64xbf16>, vector<64x32xbf16>, vector<8x32xf32> -> vector<8x32xf32>
    %c0_88 = arith.constant 0 : index
    %c0_89 = arith.constant 0 : index
    %c0_90 = arith.constant 0 : index
    %180 = vector.load %arg15[%c0_88, %c0_89, %c0_90] : memref<1x1x32xf32, #tpu.memory_space<vmem>>, vector<1x1x32xf32>
    %181 = vector.shape_cast %180 : vector<1x1x32xf32> to vector<1x32xf32>
    %182 = vector.broadcast %181 : vector<1x32xf32> to vector<8x32xf32>
    %183 = arith.addf %179, %182 : vector<8x32xf32>
    %184 = arith.addf %183, %159 : vector<8x32xf32>
    %c0_91 = arith.constant 0 : index
    %c0_92 = arith.constant 0 : index
    %c0_93 = arith.constant 0 : index
    %185 = vector.load %arg16[%c0_91, %c0_92, %c0_93] : memref<1x1x32xf32, #tpu.memory_space<vmem>>, vector<1x1x32xf32>
    %186 = vector.shape_cast %185 : vector<1x1x32xf32> to vector<1x32xf32>
    %c0_94 = arith.constant 0 : index
    %c0_95 = arith.constant 0 : index
    %c0_96 = arith.constant 0 : index
    %187 = vector.load %arg17[%c0_94, %c0_95, %c0_96] : memref<1x1x32xf32, #tpu.memory_space<vmem>>, vector<1x1x32xf32>
    %188 = vector.shape_cast %187 : vector<1x1x32xf32> to vector<1x32xf32>
    %cst_97 = arith.constant dense<0.000000e+00> : vector<8xf32>
    %189 = vector.multi_reduction <add>, %184, %cst_97 [1] : vector<8x32xf32> to vector<8xf32>
    %190 = vector.shape_cast %189 : vector<8xf32> to vector<8x1xf32>
    %cst_98 = arith.constant 3.200000e+01 : f32
    %191 = vector.broadcast %cst_98 : f32 to vector<8x1xf32>
    %192 = arith.divf %190, %191 : vector<8x1xf32>
    %193 = vector.broadcast %192 : vector<8x1xf32> to vector<8x32xf32>
    %194 = arith.subf %184, %193 : vector<8x32xf32>
    %195 = arith.mulf %194, %194 : vector<8x32xf32>
    %cst_99 = arith.constant dense<0.000000e+00> : vector<8xf32>
    %196 = vector.multi_reduction <add>, %195, %cst_99 [1] : vector<8x32xf32> to vector<8xf32>
    %197 = vector.shape_cast %196 : vector<8xf32> to vector<8x1xf32>
    %cst_100 = arith.constant 3.200000e+01 : f32
    %198 = vector.broadcast %cst_100 : f32 to vector<8x1xf32>
    %199 = arith.divf %197, %198 : vector<8x1xf32>
    %200 = vector.broadcast %192 : vector<8x1xf32> to vector<8x32xf32>
    %201 = arith.subf %184, %200 : vector<8x32xf32>
    %cst_101 = arith.constant 9.99999996E-13 : f32
    %202 = vector.broadcast %cst_101 : f32 to vector<8x1xf32>
    %203 = arith.addf %199, %202 : vector<8x1xf32>
    %204 = math.rsqrt %203 : vector<8x1xf32>
    %205 = vector.broadcast %204 : vector<8x1xf32> to vector<8x32xf32>
    %206 = arith.mulf %201, %205 : vector<8x32xf32>
    %207 = vector.broadcast %186 : vector<1x32xf32> to vector<8x32xf32>
    %208 = arith.mulf %206, %207 : vector<8x32xf32>
    %209 = vector.broadcast %188 : vector<1x32xf32> to vector<8x32xf32>
    %210 = arith.addf %208, %209 : vector<8x32xf32>
    %c0_102 = arith.constant 0 : index
    %c0_103 = arith.constant 0 : index
    %211 = vector.load %arg21[%c0_102, %c0_103] : memref<8x32xf32, #tpu.memory_space<vmem>>, vector<8x32xf32>
    tpu.vector_store %arg21[%c0_102, %c0_103], %210 {strides = array<i32>} : memref<8x32xf32, #tpu.memory_space<vmem>>, vector<8x32xf32>,
    %c1_i32 = arith.constant 1 : i32
    %212 = arith.cmpi eq, %arg1, %c1_i32 : i32
    %213 = arith.extui %212 : i1 to i32
    %c0_i32_104 = arith.constant 0 : i32
    %214 = arith.cmpi ne, %213, %c0_i32_104 : i32
    scf.if %214 {
      %215 = arith.truncf %210 : vector<8x32xf32> to vector<8x32xbf16>
      %c0_105 = arith.constant 0 : index
      %c0_106 = arith.constant 0 : index
      %216 = vector.load %arg18[%c0_105, %c0_106] : memref<32x128xbf16, #tpu.memory_space<vmem>>, vector<32x128xbf16>
      %cst_107 = arith.constant dense<0.000000e+00> : vector<8x128xf32>
      %217 = tpu.matmul %215, %216, %cst_107 {dimension_numbers = #tpu.dot_dimension_numbers<[1], [0], [0], [1], [0, 0, 1, 1], [], []>} : vector<8x32xbf16>, vector<32x128xbf16>, vector<8x128xf32> -> vector<8x128xf32>
      %c0_108 = arith.constant 0 : index
      %c0_109 = arith.constant 0 : index
      %218 = vector.load %arg19[%c0_108, %c0_109] : memref<1x128xf32, #tpu.memory_space<vmem>>, vector<1x128xf32>
      %219 = vector.broadcast %218 : vector<1x128xf32> to vector<8x128xf32>
      %220 = arith.addf %217, %219 : vector<8x128xf32>
      %c0_110 = arith.constant 0 : index
      %c0_111 = arith.constant 0 : index
      %c0_112 = arith.constant 0 : index
      %221 = vector.load %arg20[%c0_110, %c0_111, %c0_112] : memref<1x8x128xf32, #tpu.memory_space<vmem>>, vector<1x8x128xf32>
      %222 = vector.shape_cast %221 : vector<1x8x128xf32> to vector<8x128xf32>
      %223 = vector.shape_cast %220 : vector<8x128xf32> to vector<1x8x128xf32>
      tpu.vector_store %arg20[%c0_110, %c0_111, %c0_112], %223 {strides = array<i32>} : memref<1x8x128xf32, #tpu.memory_space<vmem>>, vector<1x8x128xf32>,
    } else {
    }
    return
  }
  func.func @transform_0(%arg0: i32, %arg1: i32) -> (i32, i32, i32) {
    %c0_i32 = arith.constant 0 : i32
    %c0_i32_0 = arith.constant 0 : i32
    %c0_i32_1 = arith.constant 0 : i32
    return %arg0, %c0_i32, %c0_i32_0 : i32, i32, i32
  }
  func.func @transform_1(%arg0: i32, %arg1: i32) -> (i32, i32, i32) {
    %c0_i32 = arith.constant 0 : i32
    %c0_i32_0 = arith.constant 0 : i32
    %c0_i32_1 = arith.constant 0 : i32
    return %arg0, %c0_i32, %c0_i32_0 : i32, i32, i32
  }
  func.func @transform_2(%arg0: i32, %arg1: i32) -> (i32, i32) {
    %c0_i32 = arith.constant 0 : i32
    %c0_i32_0 = arith.constant 0 : i32
    %c0_i32_1 = arith.constant 0 : i32
    return %c0_i32, %c0_i32_0 : i32, i32
  }
  func.func @transform_3(%arg0: i32, %arg1: i32) -> (i32, i32) {
    %c0_i32 = arith.constant 0 : i32
    %c0_i32_0 = arith.constant 0 : i32
    %c0_i32_1 = arith.constant 0 : i32
    return %c0_i32, %c0_i32_0 : i32, i32
  }
  func.func @transform_4(%arg0: i32, %arg1: i32) -> (i32, i32, i32, i32) {
    %c0_i32 = arith.constant 0 : i32
    %c0_i32_0 = arith.constant 0 : i32
    %c0_i32_1 = arith.constant 0 : i32
    %c0_i32_2 = arith.constant 0 : i32
    return %arg1, %c0_i32, %c0_i32_0, %c0_i32_1 : i32, i32, i32, i32
  }
  func.func @transform_5(%arg0: i32, %arg1: i32) -> (i32, i32, i32, i32) {
    %c0_i32 = arith.constant 0 : i32
    %c0_i32_0 = arith.constant 0 : i32
    %c0_i32_1 = arith.constant 0 : i32
    %c0_i32_2 = arith.constant 0 : i32
    return %arg1, %c0_i32, %c0_i32_0, %c0_i32_1 : i32, i32, i32, i32
  }
  func.func @transform_6(%arg0: i32, %arg1: i32) -> (i32, i32, i32) {
    %c0_i32 = arith.constant 0 : i32
    %c0_i32_0 = arith.constant 0 : i32
    %c0_i32_1 = arith.constant 0 : i32
    return %arg1, %c0_i32, %c0_i32_0 : i32, i32, i32
  }
  func.func @transform_7(%arg0: i32, %arg1: i32) -> (i32, i32, i32) {
    %c0_i32 = arith.constant 0 : i32
    %c0_i32_0 = arith.constant 0 : i32
    %c0_i32_1 = arith.constant 0 : i32
    return %arg1, %c0_i32, %c0_i32_0 : i32, i32, i32
  }
  func.func @transform_8(%arg0: i32, %arg1: i32) -> (i32, i32, i32) {
    %c0_i32 = arith.constant 0 : i32
    %c0_i32_0 = arith.constant 0 : i32
    %c0_i32_1 = arith.constant 0 : i32
    return %arg1, %c0_i32, %c0_i32_0 : i32, i32, i32
  }
  func.func @transform_9(%arg0: i32, %arg1: i32) -> (i32, i32, i32) {
    %c0_i32 = arith.constant 0 : i32
    %c0_i32_0 = arith.constant 0 : i32
    %c0_i32_1 = arith.constant 0 : i32
    return %arg1, %c0_i32, %c0_i32_0 : i32, i32, i32
  }
  func.func @transform_10(%arg0: i32, %arg1: i32) -> (i32, i32, i32) {
    %c0_i32 = arith.constant 0 : i32
    %c0_i32_0 = arith.constant 0 : i32
    %c0_i32_1 = arith.constant 0 : i32
    return %arg1, %c0_i32, %c0_i32_0 : i32, i32, i32
  }
  func.func @transform_11(%arg0: i32, %arg1: i32) -> (i32, i32, i32) {
    %c0_i32 = arith.constant 0 : i32
    %c0_i32_0 = arith.constant 0 : i32
    %c0_i32_1 = arith.constant 0 : i32
    return %arg1, %c0_i32, %c0_i32_0 : i32, i32, i32
  }
  func.func @transform_12(%arg0: i32, %arg1: i32) -> (i32, i32, i32) {
    %c0_i32 = arith.constant 0 : i32
    %c0_i32_0 = arith.constant 0 : i32
    %c0_i32_1 = arith.constant 0 : i32
    return %arg1, %c0_i32, %c0_i32_0 : i32, i32, i32
  }
  func.func @transform_13(%arg0: i32, %arg1: i32) -> (i32, i32, i32) {
    %c0_i32 = arith.constant 0 : i32
    %c0_i32_0 = arith.constant 0 : i32
    %c0_i32_1 = arith.constant 0 : i32
    return %arg1, %c0_i32, %c0_i32_0 : i32, i32, i32
  }
  func.func @transform_14(%arg0: i32, %arg1: i32) -> (i32, i32, i32) {
    %c0_i32 = arith.constant 0 : i32
    %c0_i32_0 = arith.constant 0 : i32
    %c0_i32_1 = arith.constant 0 : i32
    return %arg1, %c0_i32, %c0_i32_0 : i32, i32, i32
  }
  func.func @transform_15(%arg0: i32, %arg1: i32) -> (i32, i32, i32) {
    %c0_i32 = arith.constant 0 : i32
    %c0_i32_0 = arith.constant 0 : i32
    %c0_i32_1 = arith.constant 0 : i32
    return %arg1, %c0_i32, %c0_i32_0 : i32, i32, i32
  }
  func.func @transform_16(%arg0: i32, %arg1: i32) -> (i32, i32) {
    %c0_i32 = arith.constant 0 : i32
    %c0_i32_0 = arith.constant 0 : i32
    %c0_i32_1 = arith.constant 0 : i32
    return %c0_i32, %c0_i32_0 : i32, i32
  }
  func.func @transform_17(%arg0: i32, %arg1: i32) -> (i32, i32) {
    %c0_i32 = arith.constant 0 : i32
    %c0_i32_0 = arith.constant 0 : i32
    %c0_i32_1 = arith.constant 0 : i32
    return %c0_i32, %c0_i32_0 : i32, i32
  }
  func.func @transform_18(%arg0: i32, %arg1: i32) -> (i32, i32, i32) {
    %c0_i32 = arith.constant 0 : i32
    %c0_i32_0 = arith.constant 0 : i32
    %c0_i32_1 = arith.constant 0 : i32
    return %arg0, %c0_i32, %c0_i32_0 : i32, i32, i32
  }
}

</mosaic_0001>

<bundles_post_ra>
// kernel: _lambda_.1
= control target key start
LH: loop header
LB: loop body
LE: loop exit
PB: predicated region body
PF: predicated region fallthrough
CT: control target
= control target key end

     0   :  { %s2519_s27 = smov 0   ;;  %s2521_s28 = smov 0   ;;  %s2820_s0 = inlined_call_operand.vmem [shape: f32[2,8,32], index: 0, kind: input, shape index: {}]   ;;  %s2821_s1 = inlined_call_operand.vmem [shape: f32[2,1,8], index: 1, kind: input, shape index: {}]   ;;  %s2822_s2 = inlined_call_operand.vmem [shape: f32[1,32], index: 2, kind: input, shape index: {}]   ;;  %s2823_s3 = inlined_call_operand.vmem [shape: f32[1,32], index: 3, kind: input, shape index: {}]   ;;  %s2824_s4 = inlined_call_operand.vmem [shape: bf16[2,3,32,32], index: 4, kind: input, shape index: {}]   ;;  %s2825_s5 = inlined_call_operand.vmem [shape: f32[2,3,1,32], index: 5, kind: input, shape index: {}]   ;;  %s2826_s6 = inlined_call_operand.vmem [shape: bf16[2,32,32], index: 6, kind: input, shape index: {}]   ;;  %s2827_s7 = inlined_call_operand.vmem [shape: f32[2,1,32], index: 7, kind: input, shape index: {}]   ;;  %s2828_s8 = inlined_call_operand.vmem [shape: f32[2,1,32], index: 8, kind: input, shape index: {}]   ;;  %s2829_s9 = inlined_call_operand.vmem [shape: f32[2,1,32], index: 9, kind: input, shape index: {}]   ;;  %s2830_s10 = inlined_call_operand.vmem [shape: bf16[2,32,64], index: 10, kind: input, shape index: {}]   ;;  %s2831_s11 = inlined_call_operand.vmem [shape: f32[2,1,64], index: 11, kind: input, shape index: {}]   ;;  %s2832_s12 = inlined_call_operand.vmem [shape: bf16[2,64,32], index: 12, kind: input, shape index: {}]   ;;  %s2833_s13 = inlined_call_operand.vmem [shape: f32[2,1,32], index: 13, kind: input, shape index: {}]   ;;  %s2834_s14 = inlined_call_operand.vmem [shape: f32[2,1,32], index: 14, kind: input, shape index: {}]   ;;  %s2835_s15 = inlined_call_operand.vmem [shape: f32[2,1,32], index: 15, kind: input, shape index: {}]   ;;  %s2836_s16 = inlined_call_operand.vmem [shape: bf16[32,128], index: 16, kind: input, shape index: {}]   ;;  %s2837_s17 = inlined_call_operand.vmem [shape: f32[1,128], index: 17, kind: input, shape index: {}]   ;;  %s2838_s18 = inlined_call_operand.vmem [shape: f32[2,8,128], index: 18, kind: output, shape index: {}]  }
   0x1   :  { %2845 = sst [smem:[#allocation11_spill]] %s2820_s0  ;;  %s2523_s29 = smov 0  }
   0x2   :  { %2846 = sst [smem:[#allocation12_spill]] %s2821_s1  ;;  %s2525_s30 = smov 0  }
   0x3   :  { %2847 = sst [smem:[#allocation13_spill]] %s2822_s2  ;;  %s2527_s0 = smov 0  }
   0x4   :  { %2848 = sst [smem:[#allocation14_spill]] %s2823_s3 }
   0x5   :  { %2849 = sst [smem:[#allocation15_spill]] %s2824_s4 }
   0x6   :  { %2850 = sst [smem:[#allocation16_spill]] %s2825_s5 }
   0x7   :  { %2851 = sst [smem:[#allocation17_spill]] %s2826_s6 }
   0x8   :  { %2852 = sst [smem:[#allocation18_spill]] %s2830_s10 }
   0x9   :  { %2853 = sst [smem:[#allocation19_spill]] %s2831_s11 }
   0xa   :  { %2854 = sst [smem:[#allocation20_spill]] %s2835_s15 }
   0xb   :  { %2855 = sst [smem:[#allocation21_spill]] %s2836_s16 }
   0xc   :  { %2856 = sst [smem:[#allocation22_spill]] %s2837_s17 }
   0xd   :  { %2857 = sst [smem:[#allocation23_spill]] %s2838_s18 }
   0xe LB: > { %2858 = sst [smem:[#allocation4_spill]] %s2396_s27  ;;  %s37_s19 = sadd.s32 1, %s2404_s29  ;;  %s2412_s0 = sphi %s2527_s0, %s28_s0   ;;  %s2408_s30 = sphi %s2525_s30, %s2893_s30   ;;  %s2404_s29 = sphi %s2523_s29, %s2892_s29   ;;  %s2400_s28 = sphi %s2521_s28, %s2891_s28   ;;  %s2396_s27 = sphi %s2519_s27, %s2890_s27  }
   0xf   : > { %2859 = sst [smem:[#allocation5_spill]] %s2404_s29  ;;  %s40_s1 = sadd.s32 1, %s2408_s30 }
  0x10   : > { %2860 = sst [smem:[#allocation6_spill]] %s2408_s30  ;;  %p38_p0 = scmp.ge.s32.totalorder %s37_s19, 2 }
  0x11   : > { %2861 = sst [smem:[#allocation7_spill]] %s2412_s0  ;;  %p2063_p1 = scmp.ge.s32.totalorder %s2412_s0, 1 }
  0x12   : > { %p636_p2 = scmp.lt.s32.totalorder %s2412_s0, 5  ;;  %s2895_s19 = smov (%p38_p0, %s37_s19), 0 }
  0x13   : > { %2862 = sst [smem:[#allocation8_spill]] %s2895_s19  ;;  %s2897_s1 = smov (!%p38_p0, %s40_s1), %s2408_s30 }
  0x14   : > { %p637_p3 = pnand %p2063_p1, %p636_p2  ;;  %p42_p4 = scmp.ge.s32.totalorder %s2897_s1, 2 }
  0x16   : > { %s2899_s1 = smov (%p42_p4, %s2897_s1), 0  ;;  %640 = sbr.rel (%p637_p3) target bundleno = 3107 (0xc23), region = 92 }
  0x17   : > { %2863 = sst [smem:[#allocation9_spill]] %s2899_s1 }
  0x1d   : > { %p736_p5 = scmp.lt.s32.totalorder %s2400_s28, 1  ;;  %p743_p6 = scmp.lt.s32.totalorder %s2396_s27, 1 }
  0x1e   : > { %s2866_s1 = sld [smem:[#allocation11_spill]]  ;;  %s2867_s4 = sld [smem:[#allocation15_spill]] }
  0x1f   : > { %s2901_s28 = smov (!%p736_p5, %s2400_s28), 1  ;;  %s2868_s6 = sld [smem:[#allocation17_spill]] }
  0x20   : > { %2864 = sst [smem:[#allocation10_spill]] %s2901_s28  ;;  %s2064_s21 = sshll.u32 %s2901_s28, 3 }
  0x21   : > { %s2555_s20 = scalar_select %p743_p6, %s2396_s27, 1 }
  0x22   : > { %s2869_s5 = sld [smem:[#allocation16_spill]]  ;;  %s2870_s10 = sld [smem:[#allocation18_spill]] }
  0x23   : > { %s2282_s30 = smul.u32 48, %s2555_s20  ;;  %s2132_s0 = sshll.u32 %s2555_s20, 4 }
  0x24   : > { %s739_s19 = scalar_lea.vmem %s2866_s1, %s2064_s21  ;;  %s2283_s29 = smul.u32 3, %s2555_s20 }
  0x25   : > { %s2571_s3 = scalar_lea.vmem %s2867_s4, %s2282_s30  ;;  %s2576_s15 = scalar_lea.vmem %s2868_s6, %s2132_s0 }
  0x26   : > { %s781_s26 = scalar_lea.vmem %s2833_s13, %s2555_s20  ;;  %s784_s18 = scalar_lea.vmem %s2834_s14, %s2555_s20 }
  0x27   : > { %s2872_s4 = sld [smem:[#allocation20_spill]]  ;;  %s2873_s2 = sld [smem:[#allocation23_spill]] }
  0x28   : > { %s2581_s23 = scalar_lea.vmem %s2869_s5, %s2283_s29  ;;  %s2598_s6 = scalar_lea.vmem %s2870_s10, %s2132_s0 }
  0x29   : > { %s2134_s5 = sshll.u32 %s2555_s20, 5  ;;  %s2874_s1 = sld [smem:[#allocation4_spill]] }
  0x2a   : > { %s2612_s16 = scalar_lea.vmem %s2832_s12, %s2134_s5 }
  0x2d   : > { %s787_s10 = scalar_lea.vmem %s2872_s4, %s2555_s20  ;;  %s2625_s11 = scalar_lea.vmem %s2873_s2, %s2064_s21 }
  0x2f   : > { %p2073_p7 = scmp.ne.s32.totalorder %s2874_s1, 0 }
  0x30   : > { %v797_v0 = vld [vmem:[%s739_s19] sm:$0xff] (!%p2073_p7)  ;;  %vm800_vm0 = vcmask (!%p2073_p7), 261120   ;;  %s2875_s21 = sld [smem:[#allocation13_spill]] (!%p2073_p7)  ;;  %s2876_s25 = sld [smem:[#allocation14_spill]] (!%p2073_p7) }
  0x31   : > { %796 = sbr.rel (%p2073_p7) target bundleno = 363 (0x16b), region = 96  ;;  %v801_v1 = vsel (!%p2073_p7), %vm800_vm0, %v797_v0, 0.0 }
  0x32   : > { %802 = vadd.xlane.f32.xlu0 (!%p2073_p7), %v801_v1 }
  0x36   : > { %v2074_v11 = vld [vmem:[%s2875_s21] ss:$0 sm:$0xff] (!%p2073_p7) }
  0x37   : > { %v2075_v13 = vld [vmem:[%s2876_s25] ss:$0 sm:$0xff] (!%p2073_p7) }
  0xbf   : > { %v803_v2 = vpop.xlane.xlu0 %802 }
  0xc0   : > { %v805_v3 = vmul.f32 0.03125, %v803_v2 }
  0xc2   : > { %v806_v4 = vsub.f32 %v797_v0, %v805_v3 }
  0xc4   : > { %v807_v5 = vmul.f32 %v806_v4, %v806_v4 }
  0xc6   : > { %v808_v6 = vsel %vm800_vm0, %v807_v5, 0.0 }
  0xc7   : > { %809 = vadd.xlane.f32.xlu0 %v808_v6 }
 0x154   : > { %v810_v7 = vpop.xlane.xlu0 %809 }
 0x155   : > { %v811_v8 = vmul.f32 0.03125, %v810_v7 }
 0x157   : > { %v812_v9 = vadd.f32 1e-12, %v811_v8 }
 0x159   : > { %2334 = vrsqrt.f32 %v812_v9 }
 0x163   : > { %v2335_v10 = vpop.eup %2334 }
 0x164   : > { %v814_v12 = vmul.f32 %v2335_v10, %v806_v4 }
 0x166   : > { %v821_v14 = vmul.f32 %v2074_v11, %v814_v12 }
 0x168   : > { %v828_v15 = vadd.f32 %v2075_v13, %v821_v14 }
 0x16a   : > { %829 = vst.msk [vmem:[#allocation2] sm:$0xff] %vm800_vm0, %v828_v15 }
 0x16b PF: > { %v2336_v16 = vld [vmem:[%s2571_s3 + $0x10] sm:$0xff]   ;;  %v2414_v17 = vmov 0.0   ;;  %v2337_v18 = vld [vmem:[%s2571_s3] sm:$0xff]   ;;  %v2338_v19 = vld [vmem:[%s2571_s3 + $0x18] sm:$0xff]   ;;  %vm2415_vm1 = vmmov 0   ;;  %vm855_vm2 = vcmask 261120   ;;  %s2880_s5 = scalar_lea.vmem %s2827_s7, %s2555_s20  ;;  %s2881_s2 = scalar_lea.vmem %s2828_s8, %s2555_s20 }
 0x16c   : > { %2182 = vmatprep.subr.bf16.mxu1 %v2414_v17  ;;  %2174 = vmatprep.subr.bf16.mxu0 %v2414_v17  ;;  %v2339_v21 = vld [vmem:[%s2571_s3 + $0x8] sm:$0xff]   ;;  %v2085_v23 = vld [vmem:[%s2581_s23 + $0x1] ss:$0 sm:$0xff]  ;;  %v2076_v24 = vld [vmem:[%s2581_s23] ss:$0 sm:$0xff]  ;;  %vm1033_vm3 = vcmask 64512  }
 0x16d   : > { %2183 = vmatpush3.bf16.msra.mxu1 %v2336_v16  ;;  %2186 = vmatprep.mubr.msk.bf16.mxu1 %vm2415_vm1, %v2414_v17  ;;  %s2416_s28 = smov 112   ;;  %s2417_s24 = smov 120   ;;  %v2340_v38 = vld [vmem:[%s2571_s3 + $0x20] sm:$0xff]   ;;  %v2341_v39 = vld [vmem:[%s2571_s3 + $0x28] sm:$0xff]   ;;  %vm1103_vm4 = vcmask 1043456   ;;  %vm1267_vm5 = vcmask 130112  }
 0x16e   : > { %2184 = vmatprep.subr.bf16.mxu1 %v2414_v17  ;;  %2175 = vmatpush3.bf16.msra.mxu0 %v2337_v18  ;;  %s2418_s17 = smov 104   ;;  %s2877_s3 = sld [smem:[#allocation10_spill]]  ;;  %v2094_v57 = vld [vmem:[%s2581_s23 + $0x2] ss:$0 sm:$0xff]  ;;  %vm1385_vm6 = vcmask 195712   ;;  %vm1503_vm7 = vcmask 261312  }
 0x16f   : > { %2176 = vmatprep.subr.bf16.mxu0 %v2414_v17  ;;  %2178 = vmatprep.mubr.msk.bf16.mxu0 %vm2415_vm1, %v2414_v17  ;;  %s2878_s27 = sld [smem:[#allocation12_spill]]  ;;  %s2419_s23 = smov 8   ;;  %vm1716_vm8 = vcmask 523264  }
 0x170   : > { %s2420_s29 = smov 16   ;;  %s2421_s1 = smov 24  }
 0x171   : > { %v2645_v20 = vld [vmem:[#allocation2] sm:$0xff]  ;;  %2185 = vmatpush3.bf16.msra.mxu1 %v2338_v19 }
 0x172   : > { %v831_v22 = vpack.c.bf16 %v2645_v20, %v2645_v20  ;;  %2177 = vmatpush3.bf16.msra.mxu0 %v2339_v21  ;;  %2198 = vmatprep.subr.bf16.mxu1 %v2414_v17 }
 0x173   : > { %2190 = vmatprep.subr.bf16.mxu0 %v2414_v17 }
 0x174   : > { %2187 = vmatmul.mubr.msk.bf16.vlgmr.msra.gmra.mrb[0].mxu1 %vm855_vm2, %v831_v22 }
 0x175   : > { %2179 = vmatmul.mubr.msk.bf16.vlgmr.msra.gmra.mrb[0].mxu0 %vm855_vm2, %v831_v22  ;;  %2200 = vmatprep.mubr.msk.bf16.mxu1 %vm2415_vm1, %v2414_v17  ;;  %s2879_s22 = scalar_lea.vmem %s2878_s27, %s2877_s3  ;;  %s2883_s3 = sld [smem:[#allocation19_spill]] }
 0x176   : > { %2194 = vmatprep.mubr.msk.bf16.mxu0 %vm2415_vm1, %v2414_v17  ;;  %2191 = vmatpush3.bf16.msra.mxu0 %v2340_v38  ;;  %v2099_v50 = vld [vmem:[%s2879_s22] ss:$0 sm:$0xff] }
 0x177   : > { %2192 = vmatprep.subr.bf16.mxu0 %v2414_v17 }
 0x17a   : > { %2193 = vmatpush3.bf16.msra.mxu0 %v2341_v39 }
 0x17b   : > { %2204 = vmatprep.subr.bf16.mxu0 %v2414_v17  ;;  %s2884_s30 = scalar_lea.vmem %s2883_s3, %s2555_s20 }
 0x17d   : > { %2195 = vmatmul.mubr.msk.bf16.vlgmr.msra.gmra.mrb[4].mxu0 %vm855_vm2, %v831_v22 }
 0x17e   : > { %2206 = vmatprep.mubr.msk.bf16.mxu0 %vm2415_vm1, %v2414_v17 }
 0x247   : > { %v958_v25 = vpop.f32.mrb[0].mxu1 }
 0x248   : > { %v959_v26 = vadd.f32 %v2085_v23, %v958_v25  ;;  %v2188_v27 = vpop.f32.mrb[1].mxu1  ;;  %v893_v28 = vpop.f32.mrb[0].mxu0 }
 0x249   : > { %v961_v29 = vpop.f32.mrb[2].mxu1  ;;  %v894_v30 = vadd.f32 %v2076_v24, %v893_v28  ;;  %v2180_v31 = vpop.f32.mrb[1].mxu0 }
 0x24a   : > { %v1031_v32 = vpack.c.bf16 %v959_v26, %v959_v26  ;;  %v2189_v33 = vpop.f32.mrb[3].mxu1  ;;  %v896_v34 = vpop.f32.mrb[2].mxu0 }
 0x24b   : > { %v2181_v35 = vpop.f32.mrb[3].mxu0  ;;  %v1030_v36 = vpack.c.bf16 %v894_v30, %v894_v30 }
 0x24c   : > { %1271 = vrot.lane.b32.xlu1 %v1031_v32, %s2416_s28  ;;  %1152 = vrot.lane.b32.xlu0 %v1031_v32, %s2417_s24  ;;  %v1038_v37 = vsel %vm1033_vm3, %v1031_v32, 0 }
 0x24d   : > { %2199 = vmatpush3.bf16.xpose.msra.mxu1 %v1038_v37 }
 0x24e   : > { %2210 = vmatprep.subr.bf16.mxu1 %v2414_v17 }
 0x250   : > { %1269 = vrot.lane.b32.xlu1 %v1030_v36, %s2416_s28  ;;  %1149 = vrot.lane.b32.xlu0 %v1030_v36, %s2417_s24  ;;  %v1023_v58 = vpop.f32.mrb[4].mxu0 }
 0x251   : > { %v1024_v59 = vadd.f32 %v2094_v57, %v1023_v58  ;;  %v2196_v60 = vpop.f32.mrb[5].mxu0 }
 0x252   : > { %v1026_v61 = vpop.f32.mrb[6].mxu0 }
 0x253   : > { %v1032_v62 = vpack.c.bf16 %v1024_v59, %v1024_v59  ;;  %v2197_v63 = vpop.f32.mrb[7].mxu0 }
 0x254   : > { %1387 = vrot.lane.b32.xlu1 %v1030_v36, %s2418_s17  ;;  %1389 = vrot.lane.b32.xlu0 %v1031_v32, %s2418_s17 }
 0x255   : > { %2201 = vmatmul.mubr.msk.bf16.vlgmr.msra.gmra.mrb[4].mxu1 %vm1033_vm3, %v1030_v36  ;;  %v1105_v0 = vsel %vm1103_vm4, %v1032_v62, 0 }
 0x256   : > { %2212 = vmatprep.mubr.msk.bf16.mxu1 %vm2415_vm1, %v2414_v17  ;;  %2205 = vmatpush3.bf16.msra.mxu0 %v1105_v0 }
 0x257   : > { %2216 = vmatprep.subr.bf16.mxu0 %v2414_v17 }
 0x2be   : > { %v1153_v40 = vpop.permute.xlu0 %1152  ;;  %v1272_v42 = vpop.permute.xlu1 %1271 }
 0x2bf   : > { %v1158_v41 = vsel %vm1033_vm3, %v1153_v40, 0  ;;  %v1277_v44 = vsel %vm1033_vm3, %v1272_v42, 0 }
 0x2c0   : > { %2211 = vmatpush3.bf16.xpose.msra.mxu1 %v1158_v41 }
 0x2c1   : > { %2222 = vmatprep.subr.bf16.mxu1 %v2414_v17 }
 0x2c2   : > { %v1150_v43 = vpop.permute.xlu0 %1149  ;;  %v1270_v46 = vpop.permute.xlu1 %1269 }
 0x2c6   : > { %v1390_v45 = vpop.permute.xlu0 %1389  ;;  %v1388_v48 = vpop.permute.xlu1 %1387 }
 0x2c7   : > { %2213 = vmatmul.mubr.msk.bf16.vlgmr.msra.gmra.mrb[8].mxu1 %vm1033_vm3, %v1150_v43  ;;  %v1395_v47 = vsel %vm1033_vm3, %v1390_v45, 0 }
 0x2c8   : > { %2223 = vmatpush3.bf16.xpose.msra.mxu1 %v1277_v44  ;;  %2224 = vmatprep.mubr.msk.bf16.mxu1 %vm2415_vm1, %v2414_v17 }
 0x2c9   : > { %2234 = vmatprep.subr.bf16.mxu1 %v2414_v17 }
 0x2cf   : > { %2225 = vmatmul.mubr.msk.bf16.vlgmr.msra.gmra.mrb[12].mxu1 %vm1033_vm3, %v1270_v46 }
 0x2d0   : > { %2235 = vmatpush3.bf16.xpose.msra.mxu1 %v1395_v47  ;;  %2236 = vmatprep.mubr.msk.bf16.mxu1 %vm2415_vm1, %v2414_v17 }
 0x2d1   : > { %2246 = vmatprep.subr.bf16.mxu1 %v2414_v17 }
 0x2d7   : > { %2237 = vmatmul.mubr.msk.bf16.vlgmr.msra.gmra.mrb[16].mxu1 %vm1033_vm3, %v1388_v48 }
 0x2d8   : > { %2250 = vmatprep.mubr.msk.bf16.mxu1 %vm2415_vm1, %v2414_v17 }
 0x328   : > { %v1074_v49 = vpop.f32.mrb[4].mxu1 }
 0x329   : > { %v1080_v51 = vmul.f32 0.35355338, %v1074_v49  ;;  %v2202_v52 = vpop.f32.mrb[5].mxu1 }
 0x32a   : > { %v1077_v53 = vpop.f32.mrb[6].mxu1 }
 0x32b   : > { %v2203_v54 = vpop.f32.mrb[7].mxu1  ;;  %v1087_v55 = vadd.f32 %v2099_v50, %v1080_v51 }
 0x32d   : > { %v1088_v56 = vsel %vm1033_vm3, %v1087_v55, -inf }
 0x32e   : > { %1089 = vmax.xlane.f32.xlu0 %v1088_v56 }
 0x39a   : > { %v1194_v1 = vpop.f32.mrb[8].mxu1 }
 0x39b   : > { %v1200_v2 = vmul.f32 0.35355338, %v1194_v1  ;;  %v2214_v3 = vpop.f32.mrb[9].mxu1 }
 0x39c   : > { %v1197_v4 = vpop.f32.mrb[10].mxu1 }
 0x39d   : > { %v2215_v5 = vpop.f32.mrb[11].mxu1  ;;  %v1201_v6 = vadd.f32 %v2099_v50, %v1200_v2 }
 0x39f   : > { %v1202_v7 = vsel %vm1033_vm3, %v1201_v6, -inf }
 0x3a0   : > { %1203 = vmax.xlane.f32.xlu1 %v1202_v7 }
 0x3a2   : > { %v1313_v8 = vpop.f32.mrb[12].mxu1 }
 0x3a3   : > { %v1319_v9 = vmul.f32 0.35355338, %v1313_v8  ;;  %v2226_v10 = vpop.f32.mrb[13].mxu1 }
 0x3a4   : > { %v1316_v11 = vpop.f32.mrb[14].mxu1  ;;  %v2342_v10 = vld [vmem:[%s2576_s15] sm:$0xff]  }
 0x3a5   : > { %v2227_v12 = vpop.f32.mrb[15].mxu1  ;;  %v1320_v13 = vadd.f32 %v2099_v50, %v1319_v9  ;;  %2247 = vmatpush3.bf16.msra.mxu1 %v2342_v10  ;;  %v2343_v11 = vld [vmem:[%s2576_s15 + $0x8] sm:$0xff]  }
 0x3a6   : > { %2248 = vmatprep.subr.bf16.mxu1 %v2414_v17 }
 0x3a7   : > { %v1321_v14 = vsel %vm1033_vm3, %v1320_v13, -inf }
 0x3a8   : > { %1322 = vmax.xlane.f32.xlu0 %v1321_v14 }
 0x3a9   : > { %2249 = vmatpush3.bf16.msra.mxu1 %v2343_v11 }
 0x3aa   : > { %v1431_v15 = vpop.f32.mrb[16].mxu1  ;;  %2262 = vmatprep.subr.bf16.mxu1 %v2414_v17 }
 0x3ab   : > { %v1437_v16 = vmul.f32 0.35355338, %v1431_v15  ;;  %v2238_v18 = vpop.f32.mrb[17].mxu1 }
 0x3ac   : > { %v1434_v19 = vpop.f32.mrb[18].mxu1 }
 0x3ad   : > { %v2239_v21 = vpop.f32.mrb[19].mxu1  ;;  %v1438_v22 = vadd.f32 %v2099_v50, %v1437_v16 }
 0x3af   : > { %v1439_v23 = vsel %vm1033_vm3, %v1438_v22, -inf }
 0x3b0   : > { %1440 = vmax.xlane.f32.xlu0 %v1439_v23 }
 0x3bb   : > { %v1090_v24 = vpop.xlane.xlu0 %1089 }
 0x3bc   : > { %v1091_v25 = vsub.f32 %v1087_v55, %v1090_v24 }
 0x3be   : > { %v1092_v26 = vmul.f32 1.442695, %v1091_v25 }
 0x3c0   : > { %2350 = vpow2.f32 %v1092_v26 }
 0x3ca   : > { %v2351_v27 = vpop.eup %2350 }
 0x3cb   : > { %v1094_v28 = vsel %vm1033_vm3, %v2351_v27, 0.0 }
 0x3cc   : > { %1095 = vadd.xlane.f32.xlu1 %v1094_v28 }
 0x3dd   : > { %1215 = vrot.lane.b32.xlu1 %v1032_v62, %s2417_s24 }
 0x42d   : > { %v1204_v29 = vpop.xlane.xlu1 %1203 }
 0x42e   : > { %v1205_v30 = vsub.f32 %v1201_v6, %v1204_v29 }
 0x430   : > { %v1206_v31 = vmul.f32 1.442695, %v1205_v30 }
 0x432   : > { %2352 = vpow2.f32 %v1206_v31 }
 0x435   : > { %v1323_v32 = vpop.xlane.xlu0 %1322 }
 0x436   : > { %v1324_v33 = vsub.f32 %v1320_v13, %v1323_v32 }
 0x438   : > { %v1325_v34 = vmul.f32 1.442695, %v1324_v33 }
 0x43a   : > { %2354 = vpow2.f32 %v1325_v34 }
 0x43c   : > { %v2353_v35 = vpop.eup %2352 }
 0x43d   : > { %v1441_v36 = vpop.xlane.xlu0 %1440  ;;  %v1208_v37 = vsel %vm1033_vm3, %v2353_v35, 0.0 }
 0x43e   : > { %v1442_v38 = vsub.f32 %v1438_v22, %v1441_v36  ;;  %1209 = vadd.xlane.f32.xlu0 %v1208_v37 }
 0x440   : > { %v1443_v39 = vmul.f32 1.442695, %v1442_v38 }
 0x442   : > { %2356 = vpow2.f32 %v1443_v39 }
 0x444   : > { %v2355_v40 = vpop.eup %2354 }
 0x445   : > { %v1327_v41 = vsel %vm1033_vm3, %v2355_v40, 0.0 }
 0x446   : > { %1328 = vadd.xlane.f32.xlu1 %v1327_v41  ;;  %v2345_v41 = vld [vmem:[%s2598_s6 + $0x8] sm:$0xff]  }
 0x44c   : > { %v2357_v42 = vpop.eup %2356 }
 0x44d   : > { %v1445_v43 = vsel %vm1033_vm3, %v2357_v42, 0.0 }
 0x44e   : > { %1446 = vadd.xlane.f32.xlu0 %v1445_v43 }
 0x457   : > { %1451 = vrot.lane.b32.xlu1 %v1032_v62, %s2418_s17 }
 0x459   : > { %v1096_v44 = vpop.xlane.xlu1 %1095 }
 0x45a   : > { %2358 = vrcp.f32 %v1096_v44 }
 0x45d   : > { %v1216_v46 = vpop.permute.xlu1 %1215 }
 0x45e   : > { %v1221_v49 = vsel %vm1103_vm4, %v1216_v46, 0 }
 0x464   : > { %v2359_v45 = vpop.eup %2358  ;;  %1333 = vrot.lane.b32.xlu0 %v1032_v62, %s2416_s28 }
 0x465   : > { %v1098_v47 = vmul.f32 %v2359_v45, %v2351_v27  ;;  %v2107_v27 = vld [vmem:[%s2880_s5] ss:$0 sm:$0xff] }
 0x466   : > { %v2111_v45 = vld [vmem:[%s2881_s2] ss:$0 sm:$0xff] }
 0x467   : > { %v1099_v48 = vpack.c.bf16 %v1098_v47, %v1098_v47 }
 0x469   : > { %2207 = vmatmul.mubr.msk.bf16.vlgmr.msra.gmra.mrb[8].mxu0 %vm1033_vm3, %v1099_v48 }
 0x46a   : > { %2217 = vmatpush3.bf16.msra.mxu0 %v1221_v49  ;;  %2218 = vmatprep.mubr.msk.bf16.mxu0 %vm2415_vm1, %v2414_v17 }
 0x46b   : > { %2228 = vmatprep.subr.bf16.mxu0 %v2414_v17 }
 0x4cb   : > { %v1210_v50 = vpop.xlane.xlu0 %1209 }
 0x4cc   : > { %2360 = vrcp.f32 %v1210_v50 }
 0x4d3   : > { %v1329_v51 = vpop.xlane.xlu1 %1328 }
 0x4d4   : > { %2362 = vrcp.f32 %v1329_v51  ;;  %v2346_v51 = vld [vmem:[%s2612_s16] sm:$0xff]  }
 0x4d6   : > { %v2361_v52 = vpop.eup %2360 }
 0x4d7   : > { %v1212_v53 = vmul.f32 %v2361_v52, %v2353_v35  ;;  %v1452_v60 = vpop.permute.xlu1 %1451  ;;  %v2347_v52 = vld [vmem:[%s2612_s16 + $0x8] sm:$0xff]  }
 0x4d8   : > { %v1457_v62 = vsel %vm1103_vm4, %v1452_v60, 0 }
 0x4d9   : > { %v1213_v54 = vpack.c.bf16 %v1212_v53, %v1212_v53  ;;  %v2348_v53 = vld [vmem:[%s2612_s16 + $0x10] sm:$0xff]  }
 0x4db   : > { %v1447_v55 = vpop.xlane.xlu0 %1446  ;;  %2219 = vmatmul.mubr.msk.bf16.vlgmr.msra.gmra.mrb[12].mxu0 %vm1033_vm3, %v1213_v54  ;;  %v2349_v54 = vld [vmem:[%s2612_s16 + $0x18] sm:$0xff]  }
 0x4dc   : > { %2364 = vrcp.f32 %v1447_v55  ;;  %2230 = vmatprep.mubr.msk.bf16.mxu0 %vm2415_vm1, %v2414_v17  ;;  %v2113_v55 = vld [vmem:[%s2884_s30] ss:$0 sm:$0xff] }
 0x4de   : > { %v2363_v56 = vpop.eup %2362 }
 0x4df   : > { %v1331_v57 = vmul.f32 %v2363_v56, %v2355_v40  ;;  %v1334_v58 = vpop.permute.xlu0 %1333  ;;  %v2344_v40 = vld [vmem:[%s2598_s6] sm:$0xff]   ;;  %s2882_s6 = scalar_lea.vmem %s2829_s9, %s2555_s20 }
 0x4e0   : > { %v1339_v59 = vsel %vm1103_vm4, %v1334_v58, 0  ;;  %v2112_v47 = vld [vmem:[%s2882_s6] ss:$0 sm:$0xff] }
 0x4e1   : > { %2229 = vmatpush3.bf16.msra.mxu0 %v1339_v59  ;;  %v1332_v61 = vpack.c.bf16 %v1331_v57, %v1331_v57 }
 0x4e2   : > { %2240 = vmatprep.subr.bf16.mxu0 %v2414_v17 }
 0x4e4   : > { %2231 = vmatmul.mubr.msk.bf16.vlgmr.msra.gmra.mrb[16].mxu0 %vm1033_vm3, %v1332_v61 }
 0x4e5   : > { %2241 = vmatpush3.bf16.msra.mxu0 %v1457_v62  ;;  %2242 = vmatprep.mubr.msk.bf16.mxu0 %vm2415_vm1, %v2414_v17 }
 0x4e6   : > { %v2365_v63 = vpop.eup %2364  ;;  %2254 = vmatprep.subr.bf16.mxu0 %v2414_v17 }
 0x4e7   : > { %v1449_v0 = vmul.f32 %v2365_v63, %v2357_v42 }
 0x4e9   : > { %v1450_v1 = vpack.c.bf16 %v1449_v0, %v1449_v0 }
 0x4ec   : > { %2243 = vmatmul.mubr.msk.bf16.vlgmr.msra.gmra.mrb[20].mxu0 %vm1033_vm3, %v1450_v1 }
 0x4ed   : > { %2258 = vmatprep.mubr.msk.bf16.mxu0 %vm2415_vm1, %v2414_v17  ;;  %2255 = vmatpush3.bf16.msra.mxu0 %v2344_v40 }
 0x4ee   : > { %2256 = vmatprep.subr.bf16.mxu0 %v2414_v17 }
 0x4f1   : > { %2257 = vmatpush3.bf16.msra.mxu0 %v2345_v41 }
 0x53c   : > { %v1141_v2 = vpop.f32.mrb[8].mxu0 }
 0x53d   : > { %1147 = vst.msk [vmem:[#allocation3] sm:$0xff] %vm1033_vm3, %v1141_v2  ;;  %v2208_v3 = vpop.f32.mrb[9].mxu0  ;;  %v2117_v2 = vld [vmem:[%s781_s26] ss:$0 sm:$0xff] }
 0x53e   : > { %v1144_v4 = vpop.f32.mrb[10].mxu0 }
 0x53f   : > { %v2209_v5 = vpop.f32.mrb[11].mxu0 }
 0x5ae   : > { %v1257_v6 = vpop.f32.mrb[12].mxu0 }
 0x5af   : > { %1264 = vrot.lane.b32.xlu1 %v1257_v6, %s2419_s23  ;;  %v2220_v7 = vpop.f32.mrb[13].mxu0 }
 0x5b0   : > { %v1260_v8 = vpop.f32.mrb[14].mxu0 }
 0x5b1   : > { %v2221_v9 = vpop.f32.mrb[15].mxu0 }
 0x5b7   : > { %v1375_v12 = vpop.f32.mrb[16].mxu0 }
 0x5b8   : > { %1382 = vrot.lane.b32.xlu0 %v1375_v12, %s2420_s29  ;;  %v2232_v13 = vpop.f32.mrb[17].mxu0 }
 0x5b9   : > { %v1378_v14 = vpop.f32.mrb[18].mxu0 }
 0x5ba   : > { %v2233_v15 = vpop.f32.mrb[19].mxu0 }
 0x5bf   : > { %v1493_v16 = vpop.f32.mrb[20].mxu0 }
 0x5c0   : > { %1500 = vrot.lane.b32.xlu1 %v1493_v16, %s2421_s1  ;;  %v2244_v18 = vpop.f32.mrb[21].mxu0  ;;  %s2886_s1 = sld [smem:[#allocation4_spill]] }
 0x5c1   : > { %v1496_v19 = vpop.f32.mrb[22].mxu0 }
 0x5c2   : > { %v2245_v21 = vpop.f32.mrb[23].mxu0 }
 0x5c3   : > { %v2123_v21 = vld [vmem:[%s784_s18] ss:$0 sm:$0xff] }
 0x5c6   : > { %p2125_p8 = scmp.ne.s32.totalorder %s2886_s1, 1 }
 0x5c7   : > { %s2887_s5 = sld [smem:[#allocation21_spill]] (!%p2125_p8)  ;;  %vm2423_vm9 = vmmov (!%p2125_p8), 0   ;;  %s2888_s19 = sld [smem:[#allocation22_spill]] (!%p2125_p8) }
 0x621   : > { %v1265_v22 = vpop.permute.xlu1 %1264 }
 0x622   : > { %1268 = vst.msk [vmem:[#allocation3] sm:$0xff] %vm1267_vm5, %v1265_v22 }
 0x62a   : > { %v1383_v23 = vpop.permute.xlu0 %1382 }
 0x62b   : > { %1386 = vst.msk [vmem:[#allocation3] sm:$0xff] %vm1385_vm6, %v1383_v23  ;;  %v2124_v23 = vld [vmem:[%s787_s10] ss:$0 sm:$0xff] }
 0x632   : > { %v1501_v24 = vpop.permute.xlu1 %1500 }
 0x633   : > { %1504 = vst.msk [vmem:[#allocation3] sm:$0xff] %vm1503_vm7, %v1501_v24 }
 0x63a   : > { %v1505_v25 = vld [vmem:[#allocation3] sm:$0xff] }
 0x63b   : > { %v1506_v26 = vpack.c.bf16 %v1505_v25, %v1505_v25 }
 0x63d   : > { %2251 = vmatmul.mubr.msk.bf16.vlgmr.msra.gmra.mrb[20].mxu1 %vm855_vm2, %v1506_v26  ;;  %v2372_v26 = vld [vmem:[%s2887_s5] sm:$0xff] (!%p2125_p8)  }
 0x63e   : > { %2270 = vmatprep.mubr.msk.bf16.mxu1 %vm2415_vm1, %v2414_v17  ;;  %2263 = vmatpush3.bf16.msra.mxu1 %v2346_v51 }
 0x63f   : > { %2264 = vmatprep.subr.bf16.mxu1 %v2414_v17 }
 0x642   : > { %2265 = vmatpush3.bf16.msra.mxu1 %v2347_v52 }
 0x643   : > { %2266 = vmatprep.subr.bf16.mxu1 %v2414_v17 }
 0x646   : > { %2267 = vmatpush3.bf16.msra.mxu1 %v2348_v53 }
 0x647   : > { %2268 = vmatprep.subr.bf16.mxu1 %v2414_v17 }
 0x64a   : > { %2269 = vmatpush3.bf16.msra.mxu1 %v2349_v54 }
 0x710   : > { %v1567_v28 = vpop.f32.mrb[20].mxu1 }
 0x711   : > { %v1568_v29 = vadd.f32 %v2107_v27, %v1567_v28  ;;  %v2252_v30 = vpop.f32.mrb[21].mxu1  ;;  %v2422_v27 = vmov (!%p2125_p8), 0.0   ;;  %v2373_v28 = vld [vmem:[%s2887_s5 + $0x8] sm:$0xff] (!%p2125_p8)  }
 0x712   : > { %v1570_v31 = vpop.f32.mrb[22].mxu1  ;;  %2274 = vmatprep.subr.bf16.mxu0 (!%p2125_p8), %v2422_v27  ;;  %v2126_v30 = vld [vmem:[%s2888_s19] ss:$0 sm:$0xff] (!%p2125_p8) }
 0x713   : > { %v2253_v32 = vpop.f32.mrb[23].mxu1  ;;  %v1573_v33 = vadd.f32 %v1568_v29, %v2645_v20 }
 0x715   : > { %v1576_v34 = vsel %vm855_vm2, %v1573_v33, 0.0 }
 0x716   : > { %1577 = vadd.xlane.f32.xlu0 %v1576_v34 }
 0x7a3   : > { %v1578_v35 = vpop.xlane.xlu0 %1577 }
 0x7a4   : > { %v1580_v36 = vmul.f32 0.03125, %v1578_v35 }
 0x7a6   : > { %v1581_v37 = vsub.f32 %v1573_v33, %v1580_v36 }
 0x7a8   : > { %v1582_v38 = vmul.f32 %v1581_v37, %v1581_v37 }
 0x7aa   : > { %v1583_v39 = vsel %vm855_vm2, %v1582_v38, 0.0 }
 0x7ab   : > { %1584 = vadd.xlane.f32.xlu1 %v1583_v39 }
 0x838   : > { %v1585_v20 = vpop.xlane.xlu1 %1584 }
 0x839   : > { %v1586_v42 = vmul.f32 0.03125, %v1585_v20 }
 0x83b   : > { %v1587_v43 = vadd.f32 1e-12, %v1586_v42 }
 0x83d   : > { %2366 = vrsqrt.f32 %v1587_v43 }
 0x847   : > { %v2367_v44 = vpop.eup %2366 }
 0x848   : > { %v1589_v46 = vmul.f32 %v2367_v44, %v1581_v37 }
 0x84a   : > { %v1596_v48 = vmul.f32 %v2111_v45, %v1589_v46 }
 0x84c   : > { %v1603_v49 = vadd.f32 %v2112_v47, %v1596_v48 }
 0x84e   : > { %v1604_v50 = vpack.c.bf16 %v1603_v49, %v1603_v49 }
 0x850   : > { %2259 = vmatmul.mubr.msk.bf16.vlgmr.msra.gmra.mrb[24].mxu0 %vm855_vm2, %v1604_v50 }
 0x851   : > { %2275 = vmatpush3.bf16.msra.mxu0 (!%p2125_p8), %v2372_v26  ;;  %2278 = vmatprep.mubr.msk.bf16.mxu0 (!%p2125_p8), %vm2423_vm9, %v2422_v27 }
 0x852   : > { %2276 = vmatprep.subr.bf16.mxu0 (!%p2125_p8), %v2422_v27 }
 0x855   : > { %2277 = vmatpush3.bf16.msra.mxu0 (!%p2125_p8), %v2373_v28 }
 0x923   : > { %v1665_v56 = vpop.f32.mrb[24].mxu0 }
 0x924   : > { %v1666_v57 = vadd.f32 %v2113_v55, %v1665_v56  ;;  %v2260_v58 = vpop.f32.mrb[25].mxu0 }
 0x925   : > { %v1668_v59 = vpop.f32.mrb[26].mxu0 }
 0x926   : > { %v1672_v60 = vmul.f32 0.70710677, %v1666_v57  ;;  %v2261_v61 = vpop.f32.mrb[27].mxu0  ;;  %v1671_v63 = vmul.f32 0.5, %v1666_v57 }
 0x928   : > { %2368 = verf.f32 %v1672_v60 }
 0x932   : > { %v2369_v62 = vpop.eup %2368 }
 0x933   : > { %v1674_v0 = vadd.f32 1.0, %v2369_v62 }
 0x935   : > { %v1675_v1 = vmul.f32 %v1674_v0, %v1671_v63 }
 0x937   : > { %v1676_v17 = vpack.c.bf16 %v1675_v1, %v1675_v1 }
 0x939   : > { %2271 = vmatmul.mubr.msk.bf16.vlgmr.msra.gmra.mrb[24].mxu1 %vm1716_vm8, %v1676_v17 }
 0xa0c   : > { %v1754_v3 = vpop.f32.mrb[24].mxu1 }
 0xa0d   : > { %v1755_v4 = vadd.f32 %v2117_v2, %v1754_v3  ;;  %v2272_v5 = vpop.f32.mrb[25].mxu1 }
 0xa0e   : > { %v1757_v6 = vpop.f32.mrb[26].mxu1 }
 0xa0f   : > { %v2273_v7 = vpop.f32.mrb[27].mxu1  ;;  %v1760_v8 = vadd.f32 %v1755_v4, %v1603_v49 }
 0xa11   : > { %v1763_v9 = vsel %vm855_vm2, %v1760_v8, 0.0 }
 0xa12   : > { %1764 = vadd.xlane.f32.xlu0 %v1763_v9 }
 0xa9f   : > { %v1765_v10 = vpop.xlane.xlu0 %1764 }
 0xaa0   : > { %v1766_v11 = vmul.f32 0.03125, %v1765_v10 }
 0xaa2   : > { %v1767_v12 = vsub.f32 %v1760_v8, %v1766_v11 }
 0xaa4   : > { %v1768_v13 = vmul.f32 %v1767_v12, %v1767_v12 }
 0xaa6   : > { %v1769_v14 = vsel %vm855_vm2, %v1768_v13, 0.0 }
 0xaa7   : > { %1770 = vadd.xlane.f32.xlu0 %v1769_v14 }
 0xb34   : > { %v1771_v15 = vpop.xlane.xlu0 %1770 }
 0xb35   : > { %v1772_v16 = vmul.f32 0.03125, %v1771_v15 }
 0xb37   : > { %v1773_v18 = vadd.f32 1e-12, %v1772_v16 }
 0xb39   : > { %2370 = vrsqrt.f32 %v1773_v18 }
 0xb43   : > { %v2371_v19 = vpop.eup %2370 }
 0xb44   : > { %v1775_v22 = vmul.f32 %v2371_v19, %v1767_v12  ;;  %1794 = sbr.rel (%p2125_p8) target bundleno = 3107 (0xc23), region = 100 }
 0xb46   : > { %v1782_v24 = vmul.f32 %v2123_v21, %v1775_v22 }
 0xb48   : > { %v1789_v25 = vadd.f32 %v2124_v23, %v1782_v24 }
 0xb4a   : > { %1790 = vst.msk [vmem:[#allocation2] sm:$0xff] %vm855_vm2, %v1789_v25  ;;  %v1795_v29 = vpack.c.bf16 (!%p2125_p8), %v1789_v25, %v1789_v25 }
 0xb4c   : > { %2279 = vmatmul.mubr.msk.bf16.vlgmr.msra.gmra.mrb[0].mxu0 %vm855_vm2, %v1795_v29 }
 0xc1f   : > { %v1856_v31 = vpop.f32.mrb[0].mxu0 }
 0xc20   : > { %v1857_v32 = vadd.f32 %v2126_v30, %v1856_v31  ;;  %v2280_v33 = vpop.f32.mrb[1].mxu0 }
 0xc21   : > { %v1859_v34 = vpop.f32.mrb[2].mxu0 }
 0xc22   : > { %1862 = vst [vmem:[%s2625_s11] sm:$0xff] %v1857_v32  ;;  %v2281_v35 = vpop.f32.mrb[3].mxu0 }
 0xc23 PF: > { %s2889_s2 = sld [smem:[#allocation7_spill]]  ;;  %s2890_s27 = sld [smem:[#allocation5_spill]] }
 0xc24   : > { %s2891_s28 = sld [smem:[#allocation6_spill]]  ;;  %s2892_s29 = sld [smem:[#allocation8_spill]] }
 0xc25   : > { %s2893_s30 = sld [smem:[#allocation9_spill]] }
 0xc29   : > { %s28_s0 = sadd.s32 1, %s2889_s2  }
 0xc2a   : > { %p25_p9 = scmp.ge.s32.totalorder %s28_s0, 6  }
 0xc2c   :  { %27 = sbr.rel (!%p25_p9) target bundleno = 14 (0xe), region = 173 }

</bundles_post_ra>
